<compile_context>
chip_gen: v7x
topology: tpu7x:2x2x1
jax: 0.10.0
libtpu: 0.0.40
codegen_flags: <defaults>
</compile_context>

<pallas_src>
import functools

import jax
import jax.numpy as jnp
from jax.experimental import pallas as pl
from jax.experimental.pallas import tpu as pltpu


def _head_kernel(x_ref, w1se_ref, w2se_ref, w1_ref, s1_ref, w2_ref, b2_ref,
                 w3_ref, b3_ref, out_ref, pooled_ref, *, inv_hw):
    """One grid step: accumulate the spatial sum; on the last spatial step run
    the SE block + MLP head.

    x_ref:      (tb, C, thw)  native-layout tile (channels on sublanes, spatial on lanes)
    pooled_ref: (tb, C)       f32 VMEM accumulator (spatial sum)
    out_ref:    (tb, Npad)    lane-padded logits tile (written on the last step only)
    """
    s = pl.program_id(1)

    @pl.when(s == 0)
    def _():
        pooled_ref[...] = jnp.zeros_like(pooled_ref)

    # Lane-axis partial reduction (XLU); accumulate in f32. Hidden under the DMA.
    pooled_ref[...] += jnp.sum(x_ref[...].astype(jnp.float32), axis=-1)

    @pl.when(s == pl.num_programs(1) - 1)
    def _():
        pooled = pooled_ref[...] * inv_hw                                   # avgpool(x): (tb, C)

        # --- SEBlock (channel attention) ---
        h = jnp.dot(pooled, w1se_ref[...], preferred_element_type=jnp.float32)
        h = jnp.maximum(h, 0.0)
        se = jax.nn.sigmoid(
            jnp.dot(h, w2se_ref[...], preferred_element_type=jnp.float32))  # (tb, C)

        # avgpool(x * se) == avgpool(x) * se  (se is constant over the spatial axis)
        feat = pooled * se

        # --- fc1 (BatchNorm1d folded in) -> ReLU ---  (Dropout eval = identity)
        h1 = jnp.dot(feat, w1_ref[...], preferred_element_type=jnp.float32) + s1_ref[...]
        h1 = jnp.maximum(h1, 0.0)                                           # (tb, 512)

        # --- fc2 -> ReLU ---                          (Dropout eval = identity)
        h2 = jnp.dot(h1, w2_ref[...], preferred_element_type=jnp.float32) + b2_ref[...]
        h2 = jnp.maximum(h2, 0.0)                                           # (tb, 256)

        # --- fc3 (logits, lane-padded) ---
        out_ref[...] = (jnp.dot(h2, w3_ref[...], preferred_element_type=jnp.float32)
                        + b3_ref[...]).astype(out_ref.dtype)


def _vmem_capacity_bytes():
    try:
        return int(pltpu.get_tpu_info().vmem_capacity_bytes)
    except Exception:
        return 64 << 20   # conservative default: v7x per-TensorCore VMEM


def _pick_tiles(B, C, HW, itemsize, resident_bytes, tb_req):
    """Pick (tb, thw, pad_hw) such that no copy of x is needed (tb | B) and the
    double-buffered streamed x tile fits the per-generation VMEM budget."""
    capacity = _vmem_capacity_bytes()
    stream_budget = max(int(0.55 * capacity) - resident_bytes, 2 << 20)

    # Batch tile: a multiple of 8 that divides B (no batch padding). Prefer a
    # choice that leaves >= 2 parallel grid steps (v7x megacore balance).
    divs8 = [t for t in range(8, B + 1, 8) if B % t == 0]
    if divs8:
        pref = [t for t in divs8 if B // t >= 2] or divs8
        tb = min(pref, key=lambda t: (abs(t - tb_req), t))
    else:
        tb = B   # full-extent batch block (no sublane-divisibility constraint)

    # Spatial tile: collapse the axis when the whole plane fits; otherwise a
    # lane-dense multiple of 128 that divides HW; last resort, pad HW.
    max_thw = max(1, stream_budget // (2 * tb * C * itemsize))
    if HW <= max_thw:
        return tb, HW, 0
    cand = [d for d in range(128, max_thw + 1, 128) if HW % d == 0]
    if cand:
        return tb, cand[-1], 0
    thw = max(128, (max_thw // 128) * 128)
    return tb, thw, (-HW) % thw


def classification_head_pallas(x_nchw, params, *, tb=64):
    """x_nchw: (B, C, H, W). params: dict of weights (pre-transposed to (in, out))."""
    B, C, H, W = x_nchw.shape
    HW = H * W
    f32 = jnp.float32
    num_classes = params["b3"].shape[-1]

    # Native layout, free reshape only: (B, C, HW). No transpose / pad / cast pass.
    x = x_nchw.reshape(B, C, HW)
    itemsize = jnp.dtype(x.dtype).itemsize

    # --- fold BatchNorm1d (eval) into fc1 ---
    w1f = (params["w1"] * params["bn_scale"]).astype(f32)                       # (C, 512)
    s1 = (params["b1"] * params["bn_scale"] + params["bn_shift"]).astype(f32)   # (1, 512)

    # --- pad the class dimension to a lane-dense multiple of 128 ---
    Np = -(-max(num_classes, 1) // 128) * 128
    w3p = jnp.pad(params["w3"].astype(f32), ((0, 0), (0, Np - num_classes)))    # (256, Np)
    b3p = jnp.pad(params["b3"].astype(f32), ((0, 0), (0, Np - num_classes)))    # (1, Np)

    w1se = params["w1_se"].astype(f32)   # (C, C//r)
    w2se = params["w2_se"].astype(f32)   # (C//r, C)
    w2 = params["w2"].astype(f32)        # (512, 256)
    b2 = params["b2"].astype(f32)        # (1, 256)

    weights = (w1se, w2se, w1f, s1, w2, b2, w3p, b3p)
    weight_bytes = sum(int(w.size) * 4 for w in weights)

    # --- budget-driven tile selection ---
    resident_bytes = weight_bytes + 2 * B * Np * 4 + max(8, B) * C * 4 + (4 << 20)
    tb_, thw, pad_hw = _pick_tiles(B, C, HW, itemsize, resident_bytes, int(tb))

    if pad_hw:
        # Rare fallback (huge HW with no 128-multiple divisor under budget);
        # zero-padded spatial positions add 0 to the sum.
        x = jnp.pad(x, ((0, 0), (0, 0), (0, pad_hw)))
    HWp = HW + pad_hw

    grid = (B // tb_, HWp // thw)

    def _const_map(b, s):
        return (0, 0)

    # Weights: full-array blocks, constant index_map -> DMA'd once and resident.
    # Single-buffered (their block never changes), halving their VMEM footprint.
    try:
        weight_specs = [pl.BlockSpec(w.shape, _const_map, pipeline_mode=pl.Buffered(1))
                        for w in weights]
        weight_buf_factor = 1
    except (TypeError, AttributeError):
        weight_specs = [pl.BlockSpec(w.shape, _const_map) for w in weights]
        weight_buf_factor = 2

    x_spec = pl.BlockSpec((tb_, C, thw), lambda b, s: (b, 0, s))
    out_spec = pl.BlockSpec((tb_, Np), lambda b, s: (b, 0))

    # VMEM budget: double-buffered streamed x tile + single-buffered weights +
    # output + pooled scratch + margin, capped at physical capacity.
    x_tile_bytes = tb_ * C * thw * itemsize
    vmem_limit = int(2 * x_tile_bytes
                     + weight_buf_factor * weight_bytes
                     + 2 * tb_ * Np * 4
                     + max(8, tb_) * C * 4
                     + (4 << 20))
    vmem_limit = min(vmem_limit, _vmem_capacity_bytes())

    Cr = w1se.shape[1]
    flops = int(
        B * HW * C                                      # spatial sum
        + 2 * B * (C * Cr + Cr * C                      # SE block
                   + C * 512 + 512 * 256 + 256 * Np))   # MLP head
    cost = pl.CostEstimate(
        flops=flops,
        transcendentals=int(B * C),                     # sigmoid
        bytes_accessed=int(B * C * HW * itemsize + weight_bytes + B * Np * 4),
    )

    kernel = functools.partial(_head_kernel, inv_hw=float(1.0 / HW))

    out = pl.pallas_call(
        kernel,
        out_shape=jax.ShapeDtypeStruct((B, Np), jnp.float32),
        grid_spec=pltpu.PrefetchScalarGridSpec(
            num_scalar_prefetch=0,
            grid=grid,
            in_specs=[x_spec] + weight_specs,
            out_specs=out_spec,
            scratch_shapes=[pltpu.VMEM((tb_, C), jnp.float32)],
        ),
        compiler_params=pltpu.CompilerParams(
            dimension_semantics=("parallel", "arbitrary"),
            vmem_limit_bytes=vmem_limit,
        ),
        cost_estimate=cost,
    )(x, *weights)

    return out[:, :num_classes]


def make_params(key, input_features, num_classes, reduction=16):
    """Deterministic synthetic parameters, shapes matching the PyTorch module."""
    ks = jax.random.split(key, 12)
    C = input_features
    Cr = C // reduction
    f32 = jnp.float32

    def rnd(k, shape, scale=0.05):
        return (scale * jax.random.normal(k, shape)).astype(f32)

    # SEBlock linears (bias=False), stored transposed as (in, out) for row-major matmul.
    w1_se = rnd(ks[0], (C, Cr))
    w2_se = rnd(ks[1], (Cr, C))

    # fc1: Linear(C, 512)
    w1 = rnd(ks[2], (C, 512))
    b1 = rnd(ks[3], (1, 512))

    # bn1: BatchNorm1d(512) in eval mode -> affine scale/shift precomputed (glue).
    gamma = 1.0 + rnd(ks[4], (1, 512))
    beta = rnd(ks[5], (1, 512))
    running_mean = rnd(ks[6], (1, 512))
    running_var = (1.0 + 0.1 * jax.random.uniform(ks[7], (1, 512))).astype(f32)
    eps = 1e-5
    bn_scale = gamma / jnp.sqrt(running_var + eps)
    bn_shift = beta - running_mean * bn_scale

    # fc2: Linear(512, 256)
    w2 = rnd(ks[8], (512, 256))
    b2 = rnd(ks[9], (1, 256))

    # fc3: Linear(256, num_classes)
    w3 = rnd(ks[10], (256, num_classes))
    b3 = rnd(ks[11], (1, num_classes))

    return dict(w1_se=w1_se, w2_se=w2_se, w1=w1, b1=b1,
                bn_scale=bn_scale, bn_shift=bn_shift,
                w2=w2, b2=b2, w3=w3, b3=b3)


def reference_forward(x_nchw, params):
    """Pure-JAX reference matching the PyTorch forward (eval mode, CBAM=identity)."""
    B, C, H, W = x_nchw.shape
    pooled = jnp.mean(x_nchw.reshape(B, C, -1), axis=-1)                 # avgpool -> (B, C)
    h = jnp.maximum(pooled @ params["w1_se"], 0.0)
    s = jax.nn.sigmoid(h @ params["w2_se"])                              # (B, C)
    x_se = x_nchw * s[:, :, None, None]                                  # SE channel reweight
    feat = jnp.mean(x_se.reshape(B, C, -1), axis=-1)                     # avgpool again
    h1 = jnp.maximum(
        (feat @ params["w1"] + params["b1"]) * params["bn_scale"] + params["bn_shift"], 0.0)
    h2 = jnp.maximum(h1 @ params["w2"] + params["b2"], 0.0)
    return h2 @ params["w3"] + params["b3"]


if __name__ == "__main__":
    # Small shapes consistent with the module (reduction=16 => C % 16 == 0).
    B, C, H, W = 16, 128, 8, 8
    num_classes = 1

    key = jax.random.PRNGKey(0)
    kx, kp = jax.random.split(key)
    x = jax.random.normal(kx, (B, C, H, W), dtype=jnp.float32)
    params = make_params(kp, input_features=C, num_classes=num_classes)

    fn = jax.jit(classification_head_pallas)
    out = jax.block_until_ready(fn(x, params))
    ref = reference_forward(x, params)

    assert out.shape == (B, num_classes), out.shape
    assert jnp.allclose(out, ref, atol=2e-4, rtol=2e-4), (out, ref)
    print("KERNEL_OK")
</pallas_src>

<mosaic_0001>
module attributes {stable_mosaic.version = 11 : i64} {
  func.func @_head_kernel(%arg0: i32, %arg1: i32, %arg2: memref<8x128x64xf32, #tpu.memory_space<vmem>>, %arg3: memref<128x8xf32, #tpu.memory_space<vmem>>, %arg4: memref<8x128xf32, #tpu.memory_space<vmem>>, %arg5: memref<128x512xf32, #tpu.memory_space<vmem>>, %arg6: memref<1x512xf32, #tpu.memory_space<vmem>>, %arg7: memref<512x256xf32, #tpu.memory_space<vmem>>, %arg8: memref<1x256xf32, #tpu.memory_space<vmem>>, %arg9: memref<256x128xf32, #tpu.memory_space<vmem>>, %arg10: memref<1x128xf32, #tpu.memory_space<vmem>>, %arg11: memref<8x128xf32, #tpu.memory_space<vmem>>, %arg12: memref<8x128xf32, #tpu.memory_space<vmem>>) attributes {dimension_semantics = [#tpu.dimension_semantics<parallel>, #tpu.dimension_semantics<arbitrary>], iteration_bounds = array<i64: 2, 1>, scalar_prefetch = 0 : i64, scratch_operands = 1 : i64, tpu.core_type = #tpu.core_type<tc>, window_params = [{transform_indices = @transform_0, window_bounds = array<i64: 8, 128, 64>}, {pipeline_mode = #tpu.pipeline_mode<synchronous>, transform_indices = @transform_1, window_bounds = array<i64: 128, 8>}, {pipeline_mode = #tpu.pipeline_mode<synchronous>, transform_indices = @transform_2, window_bounds = array<i64: 8, 128>}, {pipeline_mode = #tpu.pipeline_mode<synchronous>, transform_indices = @transform_3, window_bounds = array<i64: 128, 512>}, {pipeline_mode = #tpu.pipeline_mode<synchronous>, transform_indices = @transform_4, window_bounds = array<i64: 1, 512>}, {pipeline_mode = #tpu.pipeline_mode<synchronous>, transform_indices = @transform_5, window_bounds = array<i64: 512, 256>}, {pipeline_mode = #tpu.pipeline_mode<synchronous>, transform_indices = @transform_6, window_bounds = array<i64: 1, 256>}, {pipeline_mode = #tpu.pipeline_mode<synchronous>, transform_indices = @transform_7, window_bounds = array<i64: 256, 128>}, {pipeline_mode = #tpu.pipeline_mode<synchronous>, transform_indices = @transform_8, window_bounds = array<i64: 1, 128>}, {transform_indices = @transform_9, window_bounds = array<i64: 8, 128>}]} {
    %c0_i32 = arith.constant 0 : i32
    %0 = arith.cmpi eq, %arg1, %c0_i32 : i32
    %1 = arith.extui %0 : i1 to i32
    %c0_i32_0 = arith.constant 0 : i32
    %2 = arith.cmpi ne, %1, %c0_i32_0 : i32
    scf.if %2 {
      %cst_9 = arith.constant 0.000000e+00 : f32
      %11 = vector.broadcast %cst_9 : f32 to vector<8x128xf32>
      %c0_10 = arith.constant 0 : index
      %c0_11 = arith.constant 0 : index
      %12 = vector.load %arg12[%c0_10, %c0_11] : memref<8x128xf32, #tpu.memory_space<vmem>>, vector<8x128xf32>
      tpu.vector_store %arg12[%c0_10, %c0_11], %11 {strides = array<i32>} : memref<8x128xf32, #tpu.memory_space<vmem>>, vector<8x128xf32>,
    } else {
    }
    %c0 = arith.constant 0 : index
    %c0_1 = arith.constant 0 : index
    %3 = vector.load %arg12[%c0, %c0_1] : memref<8x128xf32, #tpu.memory_space<vmem>>, vector<8x128xf32>
    %c0_2 = arith.constant 0 : index
    %c0_3 = arith.constant 0 : index
    %c0_4 = arith.constant 0 : index
    %4 = vector.load %arg2[%c0_2, %c0_3, %c0_4] : memref<8x128x64xf32, #tpu.memory_space<vmem>>, vector<8x128x64xf32>
    %cst = arith.constant dense<0.000000e+00> : vector<8x128xf32>
    %5 = vector.multi_reduction <add>, %4, %cst [2] : vector<8x128x64xf32> to vector<8x128xf32>
    %6 = arith.addf %3, %5 : vector<8x128xf32>
    %c0_5 = arith.constant 0 : index
    %c0_6 = arith.constant 0 : index
    %7 = vector.load %arg12[%c0_5, %c0_6] : memref<8x128xf32, #tpu.memory_space<vmem>>, vector<8x128xf32>
    tpu.vector_store %arg12[%c0_5, %c0_6], %6 {strides = array<i32>} : memref<8x128xf32, #tpu.memory_space<vmem>>, vector<8x128xf32>,
    %c0_i32_7 = arith.constant 0 : i32
    %8 = arith.cmpi eq, %arg1, %c0_i32_7 : i32
    %9 = arith.extui %8 : i1 to i32
    %c0_i32_8 = arith.constant 0 : i32
    %10 = arith.cmpi ne, %9, %c0_i32_8 : i32
    scf.if %10 {
      %c0_9 = arith.constant 0 : index
      %c0_10 = arith.constant 0 : index
      %11 = vector.load %arg12[%c0_9, %c0_10] : memref<8x128xf32, #tpu.memory_space<vmem>>, vector<8x128xf32>
      %cst_11 = arith.constant 1.562500e-02 : f32
      %12 = vector.broadcast %cst_11 : f32 to vector<8x128xf32>
      %13 = arith.mulf %11, %12 : vector<8x128xf32>
      %c0_12 = arith.constant 0 : index
      %c0_13 = arith.constant 0 : index
      %14 = vector.load %arg3[%c0_12, %c0_13] : memref<128x8xf32, #tpu.memory_space<vmem>>, vector<128x8xf32>
      %cst_14 = arith.constant dense<0.000000e+00> : vector<8x8xf32>
      %15 = tpu.matmul %13, %14, %cst_14 {dimension_numbers = #tpu.dot_dimension_numbers<[1], [0], [0], [1], [0, 0, 1, 1], [], []>} : vector<8x128xf32>, vector<128x8xf32>, vector<8x8xf32> -> vector<8x8xf32>
      %cst_15 = arith.constant 0.000000e+00 : f32
      %16 = vector.broadcast %cst_15 : f32 to vector<8x8xf32>
      %17 = arith.maximumf %15, %16 : vector<8x8xf32>
      %c0_16 = arith.constant 0 : index
      %c0_17 = arith.constant 0 : index
      %18 = vector.load %arg4[%c0_16, %c0_17] : memref<8x128xf32, #tpu.memory_space<vmem>>, vector<8x128xf32>
      %cst_18 = arith.constant dense<0.000000e+00> : vector<8x128xf32>
      %19 = tpu.matmul %17, %18, %cst_18 {dimension_numbers = #tpu.dot_dimension_numbers<[1], [0], [0], [1], [0, 0, 1, 1], [], []>} : vector<8x8xf32>, vector<8x128xf32>, vector<8x128xf32> -> vector<8x128xf32>
      %20 = arith.negf %19 : vector<8x128xf32>
      %21 = math.exp %20 : vector<8x128xf32>
      %cst_19 = arith.constant 1.000000e+00 : f32
      %22 = vector.broadcast %cst_19 : f32 to vector<8x128xf32>
      %23 = arith.addf %22, %21 : vector<8x128xf32>
      %24 = arith.divf %22, %23 : vector<8x128xf32>
      %25 = arith.mulf %13, %24 : vector<8x128xf32>
      %c0_20 = arith.constant 0 : index
      %c0_21 = arith.constant 0 : index
      %26 = vector.load %arg5[%c0_20, %c0_21] : memref<128x512xf32, #tpu.memory_space<vmem>>, vector<128x512xf32>
      %cst_22 = arith.constant dense<0.000000e+00> : vector<8x512xf32>
      %27 = tpu.matmul %25, %26, %cst_22 {dimension_numbers = #tpu.dot_dimension_numbers<[1], [0], [0], [1], [0, 0, 1, 1], [], []>} : vector<8x128xf32>, vector<128x512xf32>, vector<8x512xf32> -> vector<8x512xf32>
      %c0_23 = arith.constant 0 : index
      %c0_24 = arith.constant 0 : index
      %28 = vector.load %arg6[%c0_23, %c0_24] : memref<1x512xf32, #tpu.memory_space<vmem>>, vector<1x512xf32>
      %29 = vector.broadcast %28 : vector<1x512xf32> to vector<8x512xf32>
      %30 = arith.addf %27, %29 : vector<8x512xf32>
      %cst_25 = arith.constant 0.000000e+00 : f32
      %31 = vector.broadcast %cst_25 : f32 to vector<8x512xf32>
      %32 = arith.maximumf %30, %31 : vector<8x512xf32>
      %c0_26 = arith.constant 0 : index
      %c0_27 = arith.constant 0 : index
      %33 = vector.load %arg7[%c0_26, %c0_27] : memref<512x256xf32, #tpu.memory_space<vmem>>, vector<512x256xf32>
      %cst_28 = arith.constant dense<0.000000e+00> : vector<8x256xf32>
      %34 = tpu.matmul %32, %33, %cst_28 {dimension_numbers = #tpu.dot_dimension_numbers<[1], [0], [0], [1], [0, 0, 1, 1], [], []>} : vector<8x512xf32>, vector<512x256xf32>, vector<8x256xf32> -> vector<8x256xf32>
      %c0_29 = arith.constant 0 : index
      %c0_30 = arith.constant 0 : index
      %35 = vector.load %arg8[%c0_29, %c0_30] : memref<1x256xf32, #tpu.memory_space<vmem>>, vector<1x256xf32>
      %36 = vector.broadcast %35 : vector<1x256xf32> to vector<8x256xf32>
      %37 = arith.addf %34, %36 : vector<8x256xf32>
      %cst_31 = arith.constant 0.000000e+00 : f32
      %38 = vector.broadcast %cst_31 : f32 to vector<8x256xf32>
      %39 = arith.maximumf %37, %38 : vector<8x256xf32>
      %c0_32 = arith.constant 0 : index
      %c0_33 = arith.constant 0 : index
      %40 = vector.load %arg9[%c0_32, %c0_33] : memref<256x128xf32, #tpu.memory_space<vmem>>, vector<256x128xf32>
      %cst_34 = arith.constant dense<0.000000e+00> : vector<8x128xf32>
      %41 = tpu.matmul %39, %40, %cst_34 {dimension_numbers = #tpu.dot_dimension_numbers<[1], [0], [0], [1], [0, 0, 1, 1], [], []>} : vector<8x256xf32>, vector<256x128xf32>, vector<8x128xf32> -> vector<8x128xf32>
      %c0_35 = arith.constant 0 : index
      %c0_36 = arith.constant 0 : index
      %42 = vector.load %arg10[%c0_35, %c0_36] : memref<1x128xf32, #tpu.memory_space<vmem>>, vector<1x128xf32>
      %43 = vector.broadcast %42 : vector<1x128xf32> to vector<8x128xf32>
      %44 = arith.addf %41, %43 : vector<8x128xf32>
      %c0_37 = arith.constant 0 : index
      %c0_38 = arith.constant 0 : index
      %45 = vector.load %arg11[%c0_37, %c0_38] : memref<8x128xf32, #tpu.memory_space<vmem>>, vector<8x128xf32>
      tpu.vector_store %arg11[%c0_37, %c0_38], %44 {strides = array<i32>} : memref<8x128xf32, #tpu.memory_space<vmem>>, vector<8x128xf32>,
    } else {
    }
    return
  }
  func.func @transform_0(%arg0: i32, %arg1: i32) -> (i32, i32, i32) {
    %c0_i32 = arith.constant 0 : i32
    %c0_i32_0 = arith.constant 0 : i32
    return %arg0, %c0_i32, %arg1 : i32, i32, i32
  }
  func.func @transform_1(%arg0: i32, %arg1: i32) -> (i32, i32) {
    %c0_i32 = arith.constant 0 : i32
    %c0_i32_0 = arith.constant 0 : i32
    %c0_i32_1 = arith.constant 0 : i32
    return %c0_i32, %c0_i32_0 : i32, i32
  }
  func.func @transform_2(%arg0: i32, %arg1: i32) -> (i32, i32) {
    %c0_i32 = arith.constant 0 : i32
    %c0_i32_0 = arith.constant 0 : i32
    %c0_i32_1 = arith.constant 0 : i32
    return %c0_i32, %c0_i32_0 : i32, i32
  }
  func.func @transform_3(%arg0: i32, %arg1: i32) -> (i32, i32) {
    %c0_i32 = arith.constant 0 : i32
    %c0_i32_0 = arith.constant 0 : i32
    %c0_i32_1 = arith.constant 0 : i32
    return %c0_i32, %c0_i32_0 : i32, i32
  }
  func.func @transform_4(%arg0: i32, %arg1: i32) -> (i32, i32) {
    %c0_i32 = arith.constant 0 : i32
    %c0_i32_0 = arith.constant 0 : i32
    %c0_i32_1 = arith.constant 0 : i32
    return %c0_i32, %c0_i32_0 : i32, i32
  }
  func.func @transform_5(%arg0: i32, %arg1: i32) -> (i32, i32) {
    %c0_i32 = arith.constant 0 : i32
    %c0_i32_0 = arith.constant 0 : i32
    %c0_i32_1 = arith.constant 0 : i32
    return %c0_i32, %c0_i32_0 : i32, i32
  }
  func.func @transform_6(%arg0: i32, %arg1: i32) -> (i32, i32) {
    %c0_i32 = arith.constant 0 : i32
    %c0_i32_0 = arith.constant 0 : i32
    %c0_i32_1 = arith.constant 0 : i32
    return %c0_i32, %c0_i32_0 : i32, i32
  }
  func.func @transform_7(%arg0: i32, %arg1: i32) -> (i32, i32) {
    %c0_i32 = arith.constant 0 : i32
    %c0_i32_0 = arith.constant 0 : i32
    %c0_i32_1 = arith.constant 0 : i32
    return %c0_i32, %c0_i32_0 : i32, i32
  }
  func.func @transform_8(%arg0: i32, %arg1: i32) -> (i32, i32) {
    %c0_i32 = arith.constant 0 : i32
    %c0_i32_0 = arith.constant 0 : i32
    %c0_i32_1 = arith.constant 0 : i32
    return %c0_i32, %c0_i32_0 : i32, i32
  }
  func.func @transform_9(%arg0: i32, %arg1: i32) -> (i32, i32) {
    %c0_i32 = arith.constant 0 : i32
    %c0_i32_0 = arith.constant 0 : i32
    return %arg0, %c0_i32 : i32, i32
  }
}

</mosaic_0001>

<bundles_post_ra>
// kernel: classification_head_pallas.1
= control target key start
LH: loop header
LB: loop body
LE: loop exit
PB: predicated region body
PF: predicated region fallthrough
CT: control target
= control target key end

     0   :  { %s3023_s30 = smov 0   ;;  %s3025_s10 = smov 0   ;;  %s4462_s0 = inlined_call_operand.vmem [shape: f32[16,128,64], index: 0, kind: input, shape index: {}]   ;;  %s4463_s1 = inlined_call_operand.vmem [shape: f32[128,8], index: 1, kind: input, shape index: {}]   ;;  %s4464_s2 = inlined_call_operand.vmem [shape: f32[8,128], index: 2, kind: input, shape index: {}]   ;;  %s4465_s3 = inlined_call_operand.vmem [shape: f32[128,512], index: 3, kind: input, shape index: {}]   ;;  %s4466_s4 = inlined_call_operand.vmem [shape: f32[1,512], index: 4, kind: input, shape index: {}]   ;;  %s4467_s5 = inlined_call_operand.vmem [shape: f32[512,256], index: 5, kind: input, shape index: {}]   ;;  %s4468_s6 = inlined_call_operand.vmem [shape: f32[1,256], index: 6, kind: input, shape index: {}]   ;;  %s4469_s7 = inlined_call_operand.vmem [shape: f32[256,128], index: 7, kind: input, shape index: {}]   ;;  %s4470_s8 = inlined_call_operand.vmem [shape: f32[1,128], index: 8, kind: input, shape index: {}]   ;;  %s4471_s9 = inlined_call_operand.vmem [shape: f32[16,128], index: 9, kind: output, shape index: {}]  }
   0x1   :  { %s3027_s11 = smov 0  }
   0x2 LB: > { %s31_s12 = sadd.s32 1, %s2964_s10  ;;  %p2558_p0 = scmp.ge.s32.totalorder %s2968_s11, 1  ;;  %s2968_s11 = sphi %s3027_s11, %s19_s11   ;;  %s2964_s10 = sphi %s3025_s10, %s4473_s10   ;;  %s2960_s30 = sphi %s3023_s30, %s4472_s30  }
   0x3   : > { %p33_p1 = scmp.ge.s32.totalorder %s31_s12, 2  ;;  %p306_p2 = scmp.lt.s32.totalorder %s2968_s11, 3 }
   0x5   : > { %s4475_s12 = smov (%p33_p1, %s31_s12), 0  ;;  %p307_p3 = pnand %p2558_p0, %p306_p2 }
   0x6   : > { %s2559_s13 = sshll.u32 (!%p307_p3), %s2960_s30, 3  ;;  %vm493_vm0 = vcmask (!%p307_p3), 523264   ;;  %vm1017_vm1 = vcmask (!%p307_p3), 130112   ;;  %vm1024_vm2 = vcmask (!%p307_p3), 195712   ;;  %vm1031_vm3 = vcmask (!%p307_p3), 261312   ;;  %p355_p5 = scmp.lt.s32.totalorder (!%p307_p3), %s2960_s30, 1 }
   0x7   : > { %310 = sbr.rel (%p307_p3) target bundleno = 1593 (0x639), region = 56  ;;  %p346_p4 = scmp.lt.s32.totalorder (!%p307_p3), %s2559_s13, 15  ;;  %vm1038_vm4 = vcmask (!%p307_p3), 326912   ;;  %vm1045_vm5 = vcmask (!%p307_p3), 392512   ;;  %vm1052_vm6 = vcmask (!%p307_p3), 458112   ;;  %vm1059_vm7 = vcmask (!%p307_p3), 523712  }
   0x8   : > { %vm1066_vm8 = vcmask (!%p307_p3), 589312   ;;  %vm1073_vm9 = vcmask (!%p307_p3), 654912   ;;  %vm1080_vm10 = vcmask (!%p307_p3), 720512   ;;  %vm2971_vm11 = vmmov (!%p307_p3), 0  }
   0x9   : > { %vm1087_vm12 = vcmask (!%p307_p3), 786112   ;;  %vm1094_vm13 = vcmask (!%p307_p3), 851712   ;;  %vm1101_vm14 = vcmask (!%p307_p3), 917312   ;;  %vm1108_vm15 = vcmask (!%p307_p3), 982912  }
   0xe   : > { %s4477_s13 = smov (!%p346_p4, %s2559_s13), 15  ;;  %s4479_s30 = smov (!%p355_p5, %s2960_s30), 1 }
   0xf   : > { %s2568_s14 = sshll.u32 %s4477_s13, 7  ;;  %s2562_s28 = sshll.u32 %s4479_s30, 3 }
  0x10   : > { %s3047_s17 = scalar_lea.vmem %s4462_s0, %s2568_s14  ;;  %s358_s16 = scalar_lea.vmem %s4471_s9, %s2562_s28 }
  0x11   : > { %v381_v0 = vld [vmem:[%s3047_s17 + $0x80] sm:$0xff]  ;;  %v382_v2 = vld [vmem:[%s3047_s17 + $0x88] sm:$0xff]  ;;  %v383_v8 = vld [vmem:[%s3047_s17 + $0x90] sm:$0xff] }
  0x12   : > { %v365_v1 = vld [vmem:[%s3047_s17] sm:$0xff]  ;;  %v542_v3 = vsel %vm493_vm0, %v381_v0, 0.0  ;;  %v366_v5 = vld [vmem:[%s3047_s17 + $0x8] sm:$0xff]  ;;  %v545_v6 = vsel %vm493_vm0, %v382_v2, 0.0  ;;  %v367_v9 = vld [vmem:[%s3047_s17 + $0x10] sm:$0xff]  ;;  %v548_v10 = vsel %vm493_vm0, %v383_v8, 0.0 }
  0x13   : > { %v494_v4 = vsel %vm493_vm0, %v365_v1, 0.0  ;;  %543 = vadd.xlane.f32.xlu1 %v542_v3  ;;  %v497_v7 = vsel %vm493_vm0, %v366_v5, 0.0  ;;  %v500_v11 = vsel %vm493_vm0, %v367_v9, 0.0  ;;  %v398_v12 = vld [vmem:[%s3047_s17 + $0x108] sm:$0xff]  ;;  %v397_v13 = vld [vmem:[%s3047_s17 + $0x100] sm:$0xff]  ;;  %v384_v16 = vld [vmem:[%s3047_s17 + $0x98] sm:$0xff] }
  0x14   : > { %495 = vadd.xlane.f32.xlu0 %v494_v4  ;;  %v593_v14 = vsel %vm493_vm0, %v398_v12, 0.0  ;;  %v590_v15 = vsel %vm493_vm0, %v397_v13, 0.0  ;;  %v368_v17 = vld [vmem:[%s3047_s17 + $0x18] sm:$0xff]  ;;  %v551_v18 = vsel %vm493_vm0, %v384_v16, 0.0  ;;  %v413_v20 = vld [vmem:[%s3047_s17 + $0x180] sm:$0xff]  ;;  %v399_v21 = vld [vmem:[%s3047_s17 + $0x110] sm:$0xff] }
  0x15   : > { %v503_v19 = vsel %vm493_vm0, %v368_v17, 0.0  ;;  %v638_v22 = vsel %vm493_vm0, %v413_v20, 0.0  ;;  %v596_v23 = vsel %vm493_vm0, %v399_v21, 0.0  ;;  %v369_v24 = vld [vmem:[%s3047_s17 + $0x20] sm:$0xff]  ;;  %v414_v25 = vld [vmem:[%s3047_s17 + $0x188] sm:$0xff]  ;;  %v400_v28 = vld [vmem:[%s3047_s17 + $0x118] sm:$0xff] }
  0x16   : > { %v506_v26 = vsel %vm493_vm0, %v369_v24, 0.0  ;;  %v641_v27 = vsel %vm493_vm0, %v414_v25, 0.0  ;;  %v385_v29 = vld [vmem:[%s3047_s17 + $0xa0] sm:$0xff]  ;;  %v599_v30 = vsel %vm493_vm0, %v400_v28, 0.0  ;;  %v415_v33 = vld [vmem:[%s3047_s17 + $0x190] sm:$0xff]  ;;  %v370_v36 = vld [vmem:[%s3047_s17 + $0x28] sm:$0xff] }
  0x17   : > { %546 = vadd.xlane.f32.xlu1 %v545_v6  ;;  %v554_v31 = vsel %vm493_vm0, %v385_v29, 0.0  ;;  %v429_v32 = vld [vmem:[%s3047_s17 + $0x200] sm:$0xff]  ;;  %v644_v35 = vsel %vm493_vm0, %v415_v33, 0.0  ;;  %v430_v37 = vld [vmem:[%s3047_s17 + $0x208] sm:$0xff]  ;;  %v509_v38 = vsel %vm493_vm0, %v370_v36, 0.0  ;;  %v431_v44 = vld [vmem:[%s3047_s17 + $0x210] sm:$0xff] }
  0x18   : > { %498 = vadd.xlane.f32.xlu0 %v497_v7  ;;  %v686_v34 = vsel %vm493_vm0, %v429_v32, 0.0  ;;  %v689_v39 = vsel %vm493_vm0, %v430_v37, 0.0  ;;  %v401_v40 = vld [vmem:[%s3047_s17 + $0x120] sm:$0xff]  ;;  %v386_v41 = vld [vmem:[%s3047_s17 + $0xa8] sm:$0xff]  ;;  %v416_v45 = vld [vmem:[%s3047_s17 + $0x198] sm:$0xff]  ;;  %v692_v46 = vsel %vm493_vm0, %v431_v44, 0.0 }
  0x19   : > { %v602_v42 = vsel %vm493_vm0, %v401_v40, 0.0  ;;  %v557_v43 = vsel %vm493_vm0, %v386_v41, 0.0  ;;  %v647_v47 = vsel %vm493_vm0, %v416_v45, 0.0  ;;  %v446_v48 = vld [vmem:[%s3047_s17 + $0x288] sm:$0xff]  ;;  %v445_v49 = vld [vmem:[%s3047_s17 + $0x280] sm:$0xff]  ;;  %v387_v52 = vld [vmem:[%s3047_s17 + $0xb0] sm:$0xff] }
  0x1a   : > { %v737_v50 = vsel %vm493_vm0, %v446_v48, 0.0  ;;  %v734_v51 = vsel %vm493_vm0, %v445_v49, 0.0  ;;  %v371_v53 = vld [vmem:[%s3047_s17 + $0x30] sm:$0xff]  ;;  %v560_v54 = vsel %vm493_vm0, %v387_v52, 0.0  ;;  %v417_v56 = vld [vmem:[%s3047_s17 + $0x1a0] sm:$0xff]  ;;  %v402_v57 = vld [vmem:[%s3047_s17 + $0x128] sm:$0xff] }
  0x1b   : > { %549 = vadd.xlane.f32.xlu1 %v548_v10  ;;  %v512_v55 = vsel %vm493_vm0, %v371_v53, 0.0  ;;  %v650_v58 = vsel %vm493_vm0, %v417_v56, 0.0  ;;  %v605_v59 = vsel %vm493_vm0, %v402_v57, 0.0  ;;  %v447_v60 = vld [vmem:[%s3047_s17 + $0x290] sm:$0xff]  ;;  %v432_v61 = vld [vmem:[%s3047_s17 + $0x218] sm:$0xff]  ;;  %v462_v0 = vld [vmem:[%s3047_s17 + $0x308] sm:$0xff] }
  0x1c   : > { %501 = vadd.xlane.f32.xlu0 %v500_v11  ;;  %v740_v62 = vsel %vm493_vm0, %v447_v60, 0.0  ;;  %v695_v63 = vsel %vm493_vm0, %v432_v61, 0.0  ;;  %v461_v1 = vld [vmem:[%s3047_s17 + $0x300] sm:$0xff]  ;;  %v785_v2 = vsel %vm493_vm0, %v462_v0, 0.0  ;;  %v388_v4 = vld [vmem:[%s3047_s17 + $0xb8] sm:$0xff]  ;;  %v418_v8 = vld [vmem:[%s3047_s17 + $0x1a8] sm:$0xff] }
  0x1d   : > { %v782_v3 = vsel %vm493_vm0, %v461_v1, 0.0  ;;  %v372_v5 = vld [vmem:[%s3047_s17 + $0x38] sm:$0xff]  ;;  %v563_v6 = vsel %vm493_vm0, %v388_v4, 0.0  ;;  %v403_v9 = vld [vmem:[%s3047_s17 + $0x130] sm:$0xff]  ;;  %v653_v10 = vsel %vm493_vm0, %v418_v8, 0.0  ;;  %v433_v13 = vld [vmem:[%s3047_s17 + $0x220] sm:$0xff] }
  0x1e   : > { %v515_v7 = vsel %vm493_vm0, %v372_v5, 0.0  ;;  %v608_v11 = vsel %vm493_vm0, %v403_v9, 0.0  ;;  %v448_v12 = vld [vmem:[%s3047_s17 + $0x298] sm:$0xff]  ;;  %v477_v16 = vld [vmem:[%s3047_s17 + $0x380] sm:$0xff]  ;;  %v463_v17 = vld [vmem:[%s3047_s17 + $0x310] sm:$0xff] }
  0x1f   : > { %594 = vadd.xlane.f32.xlu1 %v593_v14  ;;  %v743_v14 = vsel %vm493_vm0, %v448_v12, 0.0  ;;  %v373_v20 = vld [vmem:[%s3047_s17 + $0x40] sm:$0xff]  ;;  %v478_v21 = vld [vmem:[%s3047_s17 + $0x388] sm:$0xff]  ;;  %v404_v24 = vld [vmem:[%s3047_s17 + $0x138] sm:$0xff] }
  0x20   : > { %591 = vadd.xlane.f32.xlu0 %v590_v15  ;;  %v698_v15 = vsel %vm493_vm0, %v433_v13, 0.0  ;;  %v389_v25 = vld [vmem:[%s3047_s17 + $0xc0] sm:$0xff]  ;;  %v434_v28 = vld [vmem:[%s3047_s17 + $0x228] sm:$0xff]  ;;  %v419_v29 = vld [vmem:[%s3047_s17 + $0x1b0] sm:$0xff] }
  0x21   : > { %v464_v32 = vld [vmem:[%s3047_s17 + $0x318] sm:$0xff]  ;;  %v449_v33 = vld [vmem:[%s3047_s17 + $0x2a0] sm:$0xff]  ;;  %v374_v36 = vld [vmem:[%s3047_s17 + $0x48] sm:$0xff] }
  0x22   : > { %v479_v37 = vld [vmem:[%s3047_s17 + $0x390] sm:$0xff]  ;;  %v405_v40 = vld [vmem:[%s3047_s17 + $0x140] sm:$0xff]  ;;  %v390_v41 = vld [vmem:[%s3047_s17 + $0xc8] sm:$0xff] }
  0x23   : > { %552 = vadd.xlane.f32.xlu1 %v551_v18  ;;  %v830_v18 = vsel %vm493_vm0, %v477_v16, 0.0  ;;  %v435_v44 = vld [vmem:[%s3047_s17 + $0x230] sm:$0xff]  ;;  %v420_v45 = vld [vmem:[%s3047_s17 + $0x1b8] sm:$0xff]  ;;  %v465_v48 = vld [vmem:[%s3047_s17 + $0x320] sm:$0xff] }
  0x24   : > { %504 = vadd.xlane.f32.xlu0 %v503_v19  ;;  %v788_v19 = vsel %vm493_vm0, %v463_v17, 0.0  ;;  %v450_v49 = vld [vmem:[%s3047_s17 + $0x2a8] sm:$0xff]  ;;  %v375_v52 = vld [vmem:[%s3047_s17 + $0x50] sm:$0xff]  ;;  %v480_v53 = vld [vmem:[%s3047_s17 + $0x398] sm:$0xff] }
  0x25   : > { %v406_v56 = vld [vmem:[%s3047_s17 + $0x148] sm:$0xff]  ;;  %v391_v57 = vld [vmem:[%s3047_s17 + $0xd0] sm:$0xff]  ;;  %v436_v60 = vld [vmem:[%s3047_s17 + $0x238] sm:$0xff] }
  0x26   : > { %v421_v61 = vld [vmem:[%s3047_s17 + $0x1c0] sm:$0xff]  ;;  %v466_v0 = vld [vmem:[%s3047_s17 + $0x328] sm:$0xff]  ;;  %v451_v1 = vld [vmem:[%s3047_s17 + $0x2b0] sm:$0xff] }
  0x27   : > { %639 = vadd.xlane.f32.xlu1 %v638_v22  ;;  %v518_v22 = vsel %vm493_vm0, %v373_v20, 0.0  ;;  %v376_v4 = vld [vmem:[%s3047_s17 + $0x58] sm:$0xff]  ;;  %v481_v5 = vld [vmem:[%s3047_s17 + $0x3a0] sm:$0xff]  ;;  %v407_v8 = vld [vmem:[%s3047_s17 + $0x150] sm:$0xff] }
  0x28   : > { %597 = vadd.xlane.f32.xlu0 %v596_v23  ;;  %v833_v23 = vsel %vm493_vm0, %v478_v21, 0.0  ;;  %v392_v9 = vld [vmem:[%s3047_s17 + $0xd8] sm:$0xff]  ;;  %v437_v13 = vld [vmem:[%s3047_s17 + $0x240] sm:$0xff] }
  0x29   : > { %v575_v12 = vsel %vm493_vm0, %v392_v9, 0.0  ;;  %v710_v16 = vsel %vm493_vm0, %v437_v13, 0.0  ;;  %v452_v20 = vld [vmem:[%s3047_s17 + $0x2b8] sm:$0xff] }
  0x2b   : > { %507 = vadd.xlane.f32.xlu1 %v506_v26  ;;  %v611_v26 = vsel %vm493_vm0, %v404_v24, 0.0 }
  0x2c   : > { %642 = vadd.xlane.f32.xlu0 %v641_v27  ;;  %v566_v27 = vsel %vm493_vm0, %v389_v25, 0.0  ;;  %v755_v25 = vsel %vm493_vm0, %v452_v20, 0.0  ;;  %v409_v20 = vld [vmem:[%s3047_s17 + $0x160] sm:$0xff] }
  0x2f   : > { %600 = vadd.xlane.f32.xlu1 %v599_v30  ;;  %v701_v30 = vsel %vm493_vm0, %v434_v28, 0.0 }
  0x30   : > { %555 = vadd.xlane.f32.xlu0 %v554_v31  ;;  %v656_v31 = vsel %vm493_vm0, %v419_v29, 0.0  ;;  %v377_v29 = vld [vmem:[%s3047_s17 + $0x60] sm:$0xff] }
  0x33   : > { %687 = vadd.xlane.f32.xlu1 %v686_v34  ;;  %v791_v34 = vsel %vm493_vm0, %v464_v32, 0.0 }
  0x34   : > { %645 = vadd.xlane.f32.xlu0 %v644_v35  ;;  %v746_v35 = vsel %vm493_vm0, %v449_v33, 0.0  ;;  %v530_v33 = vsel %vm493_vm0, %v377_v29, 0.0 }
  0x37   : > { %510 = vadd.xlane.f32.xlu1 %v509_v38  ;;  %v521_v38 = vsel %vm493_vm0, %v374_v36, 0.0 }
  0x38   : > { %690 = vadd.xlane.f32.xlu0 %v689_v39  ;;  %v836_v39 = vsel %vm493_vm0, %v479_v37, 0.0 }
  0x3b   : > { %603 = vadd.xlane.f32.xlu1 %v602_v42  ;;  %v614_v42 = vsel %vm493_vm0, %v405_v40, 0.0  ;;  %v408_v40 = vld [vmem:[%s3047_s17 + $0x158] sm:$0xff] }
  0x3c   : > { %558 = vadd.xlane.f32.xlu0 %v557_v43  ;;  %v569_v43 = vsel %vm493_vm0, %v390_v41, 0.0  ;;  %v393_v41 = vld [vmem:[%s3047_s17 + $0xe0] sm:$0xff] }
  0x3f   : > { %693 = vadd.xlane.f32.xlu1 %v692_v46  ;;  %v704_v46 = vsel %vm493_vm0, %v435_v44, 0.0 }
  0x40   : > { %648 = vadd.xlane.f32.xlu0 %v647_v47  ;;  %v659_v47 = vsel %vm493_vm0, %v420_v45, 0.0 }
  0x43   : > { %738 = vadd.xlane.f32.xlu1 %v737_v50  ;;  %v794_v50 = vsel %vm493_vm0, %v465_v48, 0.0 }
  0x44   : > { %735 = vadd.xlane.f32.xlu0 %v734_v51  ;;  %v749_v51 = vsel %vm493_vm0, %v450_v49, 0.0 }
  0x47   : > { %561 = vadd.xlane.f32.xlu1 %v560_v54  ;;  %v524_v54 = vsel %vm493_vm0, %v375_v52, 0.0 }
  0x48   : > { %513 = vadd.xlane.f32.xlu0 %v512_v55  ;;  %v839_v55 = vsel %vm493_vm0, %v480_v53, 0.0 }
  0x4b   : > { %651 = vadd.xlane.f32.xlu1 %v650_v58  ;;  %v617_v58 = vsel %vm493_vm0, %v406_v56, 0.0 }
  0x4c   : > { %606 = vadd.xlane.f32.xlu0 %v605_v59  ;;  %v572_v59 = vsel %vm493_vm0, %v391_v57, 0.0 }
  0x4f   : > { %741 = vadd.xlane.f32.xlu1 %v740_v62  ;;  %v707_v62 = vsel %vm493_vm0, %v436_v60, 0.0 }
  0x50   : > { %696 = vadd.xlane.f32.xlu0 %v695_v63  ;;  %v662_v63 = vsel %vm493_vm0, %v421_v61, 0.0 }
  0x53   : > { %786 = vadd.xlane.f32.xlu1 %v785_v2  ;;  %v797_v2 = vsel %vm493_vm0, %v466_v0, 0.0 }
  0x54   : > { %783 = vadd.xlane.f32.xlu0 %v782_v3  ;;  %v752_v3 = vsel %vm493_vm0, %v451_v1, 0.0 }
  0x57   : > { %564 = vadd.xlane.f32.xlu1 %v563_v6  ;;  %v527_v6 = vsel %vm493_vm0, %v376_v4, 0.0 }
  0x58   : > { %516 = vadd.xlane.f32.xlu0 %v515_v7  ;;  %v842_v7 = vsel %vm493_vm0, %v481_v5, 0.0 }
  0x5b   : > { %654 = vadd.xlane.f32.xlu1 %v653_v10  ;;  %v1006_v10 = vlaneseq }
  0x5c   : > { %609 = vadd.xlane.f32.xlu0 %v608_v11  ;;  %v620_v11 = vsel %vm493_vm0, %v407_v8, 0.0  ;;  %v483_v8 = vld [vmem:[%s3047_s17 + $0x3b0] sm:$0xff] }
  0x5f   : > { %744 = vadd.xlane.f32.xlu1 %v743_v14  ;;  %v422_v14 = vld [vmem:[%s3047_s17 + $0x1c8] sm:$0xff] }
  0x60   : > { %699 = vadd.xlane.f32.xlu0 %v698_v15  ;;  %v3191_v15 = vand.u32 127, %v1006_v10  ;;  %v665_v17 = vsel %vm493_vm0, %v422_v14, 0.0 }
  0x62   : > { %v1012_v21 = vadd.s32 4294967288, %v3191_v15  ;;  %v1026_v52 = vadd.s32 4294967272, %v3191_v15  ;;  %v1033_v9 = vadd.s32 4294967264, %v3191_v15 }
  0x63   : > { %831 = vadd.xlane.f32.xlu1 %v830_v18  ;;  %v3195_v18 = vshrl.u32 %v1006_v10, 7 }
  0x64   : > { %789 = vadd.xlane.f32.xlu0 %v788_v19  ;;  %v467_v19 = vld [vmem:[%s3047_s17 + $0x330] sm:$0xff] }
  0x65   : > { %v800_v24 = vsel %vm493_vm0, %v467_v19, 0.0  ;;  %v3208_v28 = vsub.s32 %v1012_v21, %v3195_v18  ;;  %v3239_v61 = vsub.s32 %v1026_v52, %v3195_v18  ;;  %v3257_v19 = vsub.s32 %v1033_v9, %v3195_v18  ;;  %v394_v21 = vld [vmem:[%s3047_s17 + $0xe8] sm:$0xff] }
  0x67   : > { %519 = vadd.xlane.f32.xlu1 %v518_v22 }
  0x68   : > { %834 = vadd.xlane.f32.xlu0 %v833_v23 }
  0x6b   : > { %612 = vadd.xlane.f32.xlu1 %v611_v26  ;;  %v1019_v26 = vadd.s32 4294967280, %v3191_v15 }
  0x6c   : > { %567 = vadd.xlane.f32.xlu0 %v566_v27  ;;  %v3205_v27 = vsub.s32 %v3191_v15, %v3195_v18 }
  0x6f   : > { %702 = vadd.xlane.f32.xlu1 %v701_v30  ;;  %v482_v30 = vld [vmem:[%s3047_s17 + $0x3a8] sm:$0xff] }
  0x70   : > { %657 = vadd.xlane.f32.xlu0 %v656_v31 }
  0x73   : > { %792 = vadd.xlane.f32.xlu1 %v791_v34  ;;  %v845_v34 = vsel %vm493_vm0, %v482_v30, 0.0 }
  0x74   : > { %747 = vadd.xlane.f32.xlu0 %v746_v35  ;;  %v3215_v35 = vsub.s32 %v1019_v26, %v3195_v18  ;;  %v581_v26 = vsel %vm493_vm0, %v394_v21, 0.0 }
  0x77   : > { %522 = vadd.xlane.f32.xlu1 %v521_v38 }
  0x78   : > { %837 = vadd.xlane.f32.xlu0 %v836_v39 }
  0x7b   : > { %615 = vadd.xlane.f32.xlu1 %v614_v42 }
  0x7c   : > { %570 = vadd.xlane.f32.xlu0 %v569_v43 }
  0x7f   : > { %705 = vadd.xlane.f32.xlu1 %v704_v46  ;;  %v623_v46 = vsel %vm493_vm0, %v408_v40, 0.0 }
  0x80   : > { %660 = vadd.xlane.f32.xlu0 %v659_v47  ;;  %v578_v47 = vsel %vm493_vm0, %v393_v41, 0.0 }
  0x83   : > { %795 = vadd.xlane.f32.xlu1 %v794_v50  ;;  %v438_v50 = vld [vmem:[%s3047_s17 + $0x248] sm:$0xff] }
  0x84   : > { %750 = vadd.xlane.f32.xlu0 %v749_v51  ;;  %v423_v51 = vld [vmem:[%s3047_s17 + $0x1d0] sm:$0xff]  ;;  %v713_v57 = vsel %vm493_vm0, %v438_v50, 0.0 }
  0x87   : > { %525 = vadd.xlane.f32.xlu1 %v524_v54 }
  0x88   : > { %840 = vadd.xlane.f32.xlu0 %v839_v55 }
  0x8b   : > { %618 = vadd.xlane.f32.xlu1 %v617_v58  ;;  %v668_v58 = vsel %vm493_vm0, %v423_v51, 0.0 }
  0x8c   : > { %573 = vadd.xlane.f32.xlu0 %v572_v59 }
  0x8f   : > { %708 = vadd.xlane.f32.xlu1 %v707_v62  ;;  %v468_v62 = vld [vmem:[%s3047_s17 + $0x338] sm:$0xff] }
  0x90   : > { %663 = vadd.xlane.f32.xlu0 %v662_v63  ;;  %v453_v63 = vld [vmem:[%s3047_s17 + $0x2c0] sm:$0xff] }
  0x91   : > { %v758_v4 = vsel %vm493_vm0, %v453_v63, 0.0 }
  0x93   : > { %798 = vadd.xlane.f32.xlu1 %v797_v2 }
  0x94   : > { %753 = vadd.xlane.f32.xlu0 %v752_v3  ;;  %v803_v3 = vsel %vm493_vm0, %v468_v62, 0.0 }
  0x97   : > { %528 = vadd.xlane.f32.xlu1 %v527_v6 }
  0x98   : > { %843 = vadd.xlane.f32.xlu0 %v842_v7  ;;  %v378_v7 = vld [vmem:[%s3047_s17 + $0x68] sm:$0xff] }
  0x99   : > { %v533_v14 = vsel %vm493_vm0, %v378_v7, 0.0 }
  0x9b   : > { %621 = vadd.xlane.f32.xlu1 %v620_v11 }
  0x9c   : > { %576 = vadd.xlane.f32.xlu0 %v575_v12 }
  0x9f   : > { %711 = vadd.xlane.f32.xlu1 %v710_v16  ;;  %v848_v16 = vsel %vm493_vm0, %v483_v8, 0.0 }
  0xa0   : > { %666 = vadd.xlane.f32.xlu0 %v665_v17  ;;  %v544_v22 = vpop.xlane.xlu1 %543 }
  0xa1   : > { %v496_v23 = vpop.xlane.xlu0 %495  ;;  %v1120_v36 = vrot.slane %v544_v22, %v3205_v27 }
  0xa2   : > { %v1011_v37 = vrot.slane %v496_v23, %v3205_v27 }
  0xa3   : > { %801 = vadd.xlane.f32.xlu1 %v800_v24 }
  0xa4   : > { %756 = vadd.xlane.f32.xlu0 %v755_v25  ;;  %v547_v31 = vpop.xlane.xlu1 %546  ;;  %v626_v25 = vsel %vm493_vm0, %v409_v20, 0.0 }
  0xa5   : > { %v499_v32 = vpop.xlane.xlu0 %498  ;;  %v1124_v38 = vrot.slane %v547_v31, %v3208_v28 }
  0xa6   : > { %v1016_v39 = vrot.slane %v499_v32, %v3208_v28  ;;  %v439_v32 = vld [vmem:[%s3047_s17 + $0x250] sm:$0xff] }
  0xa7   : > { %v1125_v42 = vsel %vm1017_vm1, %v1124_v38, %v1120_v36  ;;  %531 = vadd.xlane.f32.xlu1 %v530_v33  ;;  %v424_v33 = vld [vmem:[%s3047_s17 + $0x1d8] sm:$0xff] }
  0xa8   : > { %v1018_v43 = vsel %vm1017_vm1, %v1016_v39, %v1011_v37  ;;  %846 = vadd.xlane.f32.xlu0 %v845_v34  ;;  %v550_v44 = vpop.xlane.xlu1 %549  ;;  %v716_v39 = vsel %vm493_vm0, %v439_v32, 0.0  ;;  %v671_v40 = vsel %vm493_vm0, %v424_v33, 0.0 }
  0xa9   : > { %v502_v45 = vpop.xlane.xlu0 %501  ;;  %v1129_v48 = vrot.slane %v550_v44, %v3215_v35  ;;  %v454_v44 = vld [vmem:[%s3047_s17 + $0x2c8] sm:$0xff] }
  0xaa   : > { %v1023_v49 = vrot.slane %v502_v45, %v3215_v35  ;;  %v1040_v45 = vadd.s32 4294967256, %v3191_v15  ;;  %v761_v51 = vsel %vm493_vm0, %v454_v44, 0.0 }
  0xab   : > { %v1130_v53 = vsel %vm1024_vm2, %v1129_v48, %v1125_v42  ;;  %624 = vadd.xlane.f32.xlu1 %v623_v46 }
  0xac   : > { %v1025_v54 = vsel %vm1024_vm2, %v1023_v49, %v1018_v43  ;;  %579 = vadd.xlane.f32.xlu0 %v578_v47  ;;  %v595_v55 = vpop.xlane.xlu1 %594  ;;  %v469_v43 = vld [vmem:[%s3047_s17 + $0x340] sm:$0xff] }
  0xad   : > { %v592_v56 = vpop.xlane.xlu0 %591  ;;  %v1203_v59 = vrot.slane %v595_v55, %v3208_v28  ;;  %v806_v50 = vsel %vm493_vm0, %v469_v43, 0.0  ;;  %v484_v55 = vld [vmem:[%s3047_s17 + $0x3b8] sm:$0xff] }
  0xae   : > { %v1199_v60 = vrot.slane %v592_v56, %v3205_v27 }
  0xaf   : > { %714 = vadd.xlane.f32.xlu1 %v713_v57 }
  0xb0   : > { %v1204_v0 = vsel %vm1017_vm1, %v1203_v59, %v1199_v60  ;;  %669 = vadd.xlane.f32.xlu0 %v668_v58  ;;  %v553_v1 = vpop.xlane.xlu1 %552  ;;  %v851_v60 = vsel %vm493_vm0, %v484_v55, 0.0 }
  0xb1   : > { %v505_v2 = vpop.xlane.xlu0 %504  ;;  %v1134_v5 = vrot.slane %v553_v1, %v3239_v61  ;;  %v410_v1 = vld [vmem:[%s3047_s17 + $0x168] sm:$0xff] }
  0xb2   : > { %v1030_v6 = vrot.slane %v505_v2, %v3239_v61  ;;  %v395_v2 = vld [vmem:[%s3047_s17 + $0xf0] sm:$0xff]  ;;  %v629_v7 = vsel %vm493_vm0, %v410_v1, 0.0 }
  0xb3   : > { %v1135_v10 = vsel %vm1031_vm3, %v1134_v5, %v1130_v53  ;;  %804 = vadd.xlane.f32.xlu1 %v803_v3  ;;  %v3284_v53 = vsub.s32 %v1040_v45, %v3195_v18  ;;  %v584_v8 = vsel %vm493_vm0, %v395_v2, 0.0 }
  0xb4   : > { %v1032_v11 = vsel %vm1031_vm3, %v1030_v6, %v1025_v54  ;;  %759 = vadd.xlane.f32.xlu0 %v758_v4  ;;  %v640_v12 = vpop.xlane.xlu1 %639  ;;  %v379_v54 = vld [vmem:[%s3047_s17 + $0x70] sm:$0xff] }
  0xb5   : > { %v598_v13 = vpop.xlane.xlu0 %597  ;;  %v1278_v29 = vrot.slane %v640_v12, %v3205_v27  ;;  %v536_v59 = vsel %vm493_vm0, %v379_v54, 0.0  ;;  %v425_v12 = vld [vmem:[%s3047_s17 + $0x1e0] sm:$0xff] }
  0xb6   : > { %v1208_v17 = vrot.slane %v598_v13, %v3215_v35  ;;  %v674_v21 = vsel %vm493_vm0, %v425_v12, 0.0 }
  0xb7   : > { %534 = vadd.xlane.f32.xlu1 %v533_v14 }
  0xb8   : > { %v1209_v22 = vsel %vm1024_vm2, %v1208_v17, %v1204_v0  ;;  %849 = vadd.xlane.f32.xlu0 %v848_v16  ;;  %v508_v23 = vpop.xlane.xlu1 %507 }
  0xb9   : > { %v643_v24 = vpop.xlane.xlu0 %642  ;;  %v1037_v30 = vrot.slane %v508_v23, %v3257_v19 }
  0xba   : > { %v1282_v31 = vrot.slane %v643_v24, %v3208_v28  ;;  %v470_v24 = vld [vmem:[%s3047_s17 + $0x348] sm:$0xff] }
  0xbb   : > { %v1039_v34 = vsel %vm1038_vm4, %v1037_v30, %v1032_v11  ;;  %627 = vadd.xlane.f32.xlu1 %v626_v25  ;;  %v440_v11 = vld [vmem:[%s3047_s17 + $0x258] sm:$0xff]  ;;  %v455_v25 = vld [vmem:[%s3047_s17 + $0x2d0] sm:$0xff]  ;;  %v809_v33 = vsel %vm493_vm0, %v470_v24, 0.0 }
  0xbc   : > { %v1283_v36 = vsel %vm1017_vm1, %v1282_v31, %v1278_v29  ;;  %582 = vadd.xlane.f32.xlu0 %v581_v26  ;;  %v601_v37 = vpop.xlane.xlu1 %600  ;;  %v719_v20 = vsel %vm493_vm0, %v440_v11, 0.0  ;;  %v1047_v26 = vadd.s32 4294967248, %v3191_v15 }
  0xbd   : > { %v556_v38 = vpop.xlane.xlu0 %555  ;;  %v1213_v41 = vrot.slane %v601_v37, %v3239_v61 }
  0xbe   : > { %v1139_v42 = vrot.slane %v556_v38, %v3257_v19  ;;  %v3320_v38 = vsub.s32 %v1047_v26, %v3195_v18 }
  0xbf   : > { %v1214_v46 = vsel %vm1031_vm3, %v1213_v41, %v1209_v22  ;;  %717 = vadd.xlane.f32.xlu1 %v716_v39  ;;  %v380_v39 = vld [vmem:[%s3047_s17 + $0x78] sm:$0xff] }
  0xc0   : > { %v1140_v47 = vsel %vm1038_vm4, %v1139_v42, %v1135_v10  ;;  %672 = vadd.xlane.f32.xlu0 %v671_v40  ;;  %v688_v48 = vpop.xlane.xlu1 %687  ;;  %v485_v40 = vld [vmem:[%s3047_s17 + $0x3c0] sm:$0xff]  ;;  %v539_v44 = vsel %vm493_vm0, %v380_v39, 0.0 }
  0xc1   : > { %v646_v49 = vpop.xlane.xlu0 %645  ;;  %v1357_v62 = vrot.slane %v688_v48, %v3205_v27  ;;  %v854_v45 = vsel %vm493_vm0, %v485_v40, 0.0  ;;  %v411_v48 = vld [vmem:[%s3047_s17 + $0x170] sm:$0xff] }
  0xc2   : > { %v1287_v52 = vrot.slane %v646_v49, %v3215_v35  ;;  %v396_v49 = vld [vmem:[%s3047_s17 + $0xf8] sm:$0xff]  ;;  %v632_v55 = vsel %vm493_vm0, %v411_v48, 0.0 }
  0xc3   : > { %807 = vadd.xlane.f32.xlu1 %v806_v50 }
  0xc4   : > { %v1288_v56 = vsel %vm1024_vm2, %v1287_v52, %v1283_v36  ;;  %762 = vadd.xlane.f32.xlu0 %v761_v51  ;;  %v511_v57 = vpop.xlane.xlu1 %510 }
  0xc5   : > { %v691_v58 = vpop.xlane.xlu0 %690  ;;  %v1044_v63 = vrot.slane %v511_v57, %v3284_v53 }
  0xc6   : > { %v1361_v0 = vrot.slane %v691_v58, %v3208_v28 }
  0xc7   : > { %v1046_v3 = vsel %vm1045_vm5, %v1044_v63, %v1039_v34  ;;  %537 = vadd.xlane.f32.xlu1 %v536_v59  ;;  %v764_v34 = vsel %vm493_vm0, %v455_v25, 0.0  ;;  %v441_v59 = vld [vmem:[%s3047_s17 + $0x260] sm:$0xff] }
  0xc8   : > { %v1362_v4 = vsel %vm1017_vm1, %v1361_v0, %v1357_v62  ;;  %852 = vadd.xlane.f32.xlu0 %v851_v60  ;;  %v604_v5 = vpop.xlane.xlu1 %603  ;;  %v426_v60 = vld [vmem:[%s3047_s17 + $0x1e8] sm:$0xff]  ;;  %v722_v2 = vsel %vm493_vm0, %v441_v59, 0.0 }
  0xc9   : > { %v559_v6 = vpop.xlane.xlu0 %558  ;;  %v1218_v9 = vrot.slane %v604_v5, %v3257_v19 }
  0xca   : > { %v1144_v10 = vrot.slane %v559_v6, %v3284_v53  ;;  %v471_v6 = vld [vmem:[%s3047_s17 + $0x350] sm:$0xff] }
  0xcb   : > { %v1219_v13 = vsel %vm1038_vm4, %v1218_v9, %v1214_v46  ;;  %630 = vadd.xlane.f32.xlu1 %v629_v7  ;;  %v456_v7 = vld [vmem:[%s3047_s17 + $0x2d8] sm:$0xff] }
  0xcc   : > { %v1145_v14 = vsel %vm1045_vm5, %v1144_v10, %v1140_v47  ;;  %585 = vadd.xlane.f32.xlu0 %v584_v8  ;;  %v694_v16 = vpop.xlane.xlu1 %693  ;;  %v1054_v8 = vadd.s32 4294967240, %v3191_v15 }
  0xcd   : > { %v649_v17 = vpop.xlane.xlu0 %648  ;;  %v1366_v22 = vrot.slane %v694_v16, %v3215_v35 }
  0xce   : > { %v1292_v23 = vrot.slane %v649_v17, %v3239_v61 }
  0xcf   : > { %v1367_v29 = vsel %vm1024_vm2, %v1366_v22, %v1362_v4  ;;  %720 = vadd.xlane.f32.xlu1 %v719_v20  ;;  %v3355_v20 = vsub.s32 %v1054_v8, %v3195_v18  ;;  %v486_v22 = vld [vmem:[%s3047_s17 + $0x3c8] sm:$0xff] }
  0xd0   : > { %v1293_v30 = vsel %vm1031_vm3, %v1292_v23, %v1288_v56  ;;  %675 = vadd.xlane.f32.xlu0 %v674_v21  ;;  %v739_v31 = vpop.xlane.xlu1 %738  ;;  %v587_v56 = vsel %vm493_vm0, %v396_v49, 0.0  ;;  %v412_v21 = vld [vmem:[%s3047_s17 + $0x178] sm:$0xff] }
  0xd1   : > { %v736_v32 = vpop.xlane.xlu0 %735  ;;  %v1440_v36 = vrot.slane %v739_v31, %v3208_v28  ;;  %v635_v26 = vsel %vm493_vm0, %v412_v21, 0.0 }
  0xd2   : > { %v1436_v37 = vrot.slane %v736_v32, %v3205_v27  ;;  %v442_v32 = vld [vmem:[%s3047_s17 + $0x268] sm:$0xff] }
  0xd3   : > { %810 = vadd.xlane.f32.xlu1 %v809_v33  ;;  %v427_v33 = vld [vmem:[%s3047_s17 + $0x1f0] sm:$0xff]  ;;  %v725_v40 = vsel %vm493_vm0, %v442_v32, 0.0 }
  0xd4   : > { %v1441_v41 = vsel %vm1017_vm1, %v1440_v36, %v1436_v37  ;;  %765 = vadd.xlane.f32.xlu0 %v764_v34  ;;  %v562_v42 = vpop.xlane.xlu1 %561 }
  0xd5   : > { %v514_v43 = vpop.xlane.xlu0 %513  ;;  %v1149_v46 = vrot.slane %v562_v42, %v3320_v38 }
  0xd6   : > { %v1051_v47 = vrot.slane %v514_v43, %v3320_v38 }
  0xd7   : > { %v1150_v50 = vsel %vm1052_vm6, %v1149_v46, %v1145_v14  ;;  %540 = vadd.xlane.f32.xlu1 %v539_v44  ;;  %v767_v14 = vsel %vm493_vm0, %v456_v7, 0.0  ;;  %v472_v44 = vld [vmem:[%s3047_s17 + $0x358] sm:$0xff] }
  0xd8   : > { %v1053_v51 = vsel %vm1052_vm6, %v1051_v47, %v1046_v3  ;;  %855 = vadd.xlane.f32.xlu0 %v854_v45  ;;  %v652_v52 = vpop.xlane.xlu1 %651  ;;  %v677_v3 = vsel %vm493_vm0, %v426_v60, 0.0  ;;  %v457_v45 = vld [vmem:[%s3047_s17 + $0x2e0] sm:$0xff] }
  0xd9   : > { %v607_v54 = vpop.xlane.xlu0 %606  ;;  %v1297_v57 = vrot.slane %v652_v52, %v3257_v19 }
  0xda   : > { %v1223_v58 = vrot.slane %v607_v54, %v3284_v53 }
  0xdb   : > { %v1298_v62 = vsel %vm1038_vm4, %v1297_v57, %v1293_v30  ;;  %633 = vadd.xlane.f32.xlu1 %v632_v55  ;;  %v428_v55 = vld [vmem:[%s3047_s17 + $0x1f8] sm:$0xff]  ;;  %v1061_v57 = vadd.s32 4294967232, %v3191_v15 }
  0xdc   : > { %v1224_v63 = vsel %vm1045_vm5, %v1223_v58, %v1219_v13  ;;  %588 = vadd.xlane.f32.xlu0 %v587_v56  ;;  %v742_v0 = vpop.xlane.xlu1 %741  ;;  %v812_v13 = vsel %vm493_vm0, %v471_v6, 0.0  ;;  %v487_v56 = vld [vmem:[%s3047_s17 + $0x3d0] sm:$0xff] }
  0xdd   : > { %v697_v1 = vpop.xlane.xlu0 %696  ;;  %v1445_v4 = vrot.slane %v742_v0, %v3215_v35  ;;  %v860_v0 = vsel %vm493_vm0, %v487_v56, 0.0 }
  0xde   : > { %v1371_v5 = vrot.slane %v697_v1, %v3239_v61 }
  0xdf   : > { %v1446_v9 = vsel %vm1024_vm2, %v1445_v4, %v1441_v41  ;;  %723 = vadd.xlane.f32.xlu1 %v722_v2  ;;  %v680_v41 = vsel %vm493_vm0, %v427_v33, 0.0  ;;  %v3395_v2 = vsub.s32 %v1061_v57, %v3195_v18  ;;  %v443_v4 = vld [vmem:[%s3047_s17 + $0x270] sm:$0xff] }
  0xe0   : > { %v1372_v10 = vsel %vm1031_vm3, %v1371_v5, %v1367_v29  ;;  %678 = vadd.xlane.f32.xlu0 %v677_v3  ;;  %v787_v11 = vpop.xlane.xlu1 %786  ;;  %v857_v29 = vsel %vm493_vm0, %v486_v22, 0.0  ;;  %v458_v3 = vld [vmem:[%s3047_s17 + $0x2e8] sm:$0xff] }
  0xe1   : > { %v784_v12 = vpop.xlane.xlu0 %783  ;;  %v1519_v16 = vrot.slane %v787_v11, %v3208_v28  ;;  %v773_v8 = vsel %vm493_vm0, %v458_v3, 0.0 }
  0xe2   : > { %v1515_v17 = vrot.slane %v784_v12, %v3205_v27 }
  0xe3   : > { %813 = vadd.xlane.f32.xlu1 %v812_v13  ;;  %v488_v13 = vld [vmem:[%s3047_s17 + $0x3d8] sm:$0xff] }
  0xe4   : > { %v1520_v23 = vsel %vm1017_vm1, %v1519_v16, %v1515_v17  ;;  %768 = vadd.xlane.f32.xlu0 %v767_v14  ;;  %v565_v24 = vpop.xlane.xlu1 %564  ;;  %v473_v14 = vld [vmem:[%s3047_s17 + $0x360] sm:$0xff] }
  0xe5   : > { %v517_v25 = vpop.xlane.xlu0 %516  ;;  %v1154_v30 = vrot.slane %v565_v24, %v3355_v20 }
  0xe6   : > { %v1058_v31 = vrot.slane %v517_v25, %v3355_v20  ;;  %v459_v25 = vld [vmem:[%s3047_s17 + $0x2f0] sm:$0xff] }
  0xe7   : > { %v3367_v34 = vsel %vm1059_vm7, %v1154_v30, %v1150_v50  ;;  %636 = vadd.xlane.f32.xlu1 %v635_v26  ;;  %v815_v50 = vsel %vm493_vm0, %v472_v44, 0.0  ;;  %v444_v26 = vld [vmem:[%s3047_s17 + $0x278] sm:$0xff]  ;;  %v776_v33 = vsel %vm493_vm0, %v459_v25, 0.0 }
  0xe8   : > { %v1060_v36 = vsel %vm1059_vm7, %v1058_v31, %v1053_v51  ;;  %858 = vadd.xlane.f32.xlu0 %v857_v29  ;;  %v655_v37 = vpop.xlane.xlu1 %654  ;;  %v770_v51 = vsel %vm493_vm0, %v457_v45, 0.0 }
  0xe9   : > { %v610_v39 = vpop.xlane.xlu0 %609  ;;  %v1302_v42 = vrot.slane %v655_v37, %v3284_v53 }
  0xea   : > { %v1228_v43 = vrot.slane %v610_v39, %v3320_v38 }
  0xeb   : > { %v3377_v46 = vsel %vm1045_vm5, %v1302_v42, %v1298_v62  ;;  %726 = vadd.xlane.f32.xlu1 %v725_v40  ;;  %v489_v40 = vld [vmem:[%s3047_s17 + $0x3e0] sm:$0xff]  ;;  %v1068_v42 = vadd.s32 4294967224, %v3191_v15 }
  0xec   : > { %v1229_v47 = vsel %vm1052_vm6, %v1228_v43, %v1224_v63  ;;  %681 = vadd.xlane.f32.xlu0 %v680_v41  ;;  %v745_v48 = vpop.xlane.xlu1 %744  ;;  %v683_v63 = vsel %vm493_vm0, %v428_v55, 0.0  ;;  %v474_v41 = vld [vmem:[%s3047_s17 + $0x368] sm:$0xff] }
  0xed   : > { %v700_v49 = vpop.xlane.xlu0 %699  ;;  %v1450_v52 = vrot.slane %v745_v48, %v3239_v61  ;;  %v821_v48 = vsel %vm493_vm0, %v474_v41, 0.0  ;;  %v1693_v55 = vld [vmem:[%s4463_s1 + $0x8] sm:$0xff] }
  0xee   : > { %v1376_v54 = vrot.slane %v700_v49, %v3257_v19 }
  0xef   : > { %v3388_v58 = vsel %vm1031_vm3, %v1450_v52, %v1446_v9  ;;  %816 = vadd.xlane.f32.xlu1 %v815_v50  ;;  %v728_v9 = vsel %vm493_vm0, %v443_v4, 0.0  ;;  %v475_v52 = vld [vmem:[%s3047_s17 + $0x370] sm:$0xff] }
  0xf0   : > { %v1377_v59 = vsel %vm1038_vm4, %v1376_v54, %v1372_v10  ;;  %771 = vadd.xlane.f32.xlu0 %v770_v51  ;;  %v832_v60 = vpop.xlane.xlu1 %831  ;;  %v3441_v51 = vsub.s32 %v1068_v42, %v3195_v18  ;;  %v460_v54 = vld [vmem:[%s3047_s17 + $0x2f8] sm:$0xff] }
  0xf1   : > { %v790_v62 = vpop.xlane.xlu0 %789  ;;  %v1594_v10 = vrot.slane %v832_v60, %v3205_v27  ;;  %v818_v27 = vsel %vm493_vm0, %v473_v14, 0.0 }
  0xf2   : > { %v1524_v1 = vrot.slane %v790_v62, %v3215_v35 }
  0xf3   : > { %684 = vadd.xlane.f32.xlu1 %v683_v63  ;;  %v824_v63 = vsel %vm493_vm0, %v475_v52, 0.0 }
  0xf4   : > { %v1525_v5 = vsel %vm1024_vm2, %v1524_v1, %v1520_v23  ;;  %861 = vadd.xlane.f32.xlu0 %v860_v0  ;;  %v520_v6 = vpop.xlane.xlu1 %519  ;;  %v863_v23 = vsel %vm493_vm0, %v488_v13, 0.0  ;;  %v779_v0 = vsel %vm493_vm0, %v460_v54, 0.0  ;;  %v2970_v1 = vmov 0.0|0.0  }
  0xf5   : > { %v835_v7 = vpop.xlane.xlu0 %834  ;;  %v1065_v11 = vrot.slane %v520_v6, %v3395_v2  ;;  %2663 = vmatprep.subr.bf16.mxu0 %v2970_v1  ;;  %v1694_v6 = vld [vmem:[%s4463_s1 + $0x10] sm:$0xff] }
  0xf6   : > { %v1598_v12 = vrot.slane %v835_v7, %v3208_v28  ;;  %v1695_v7 = vld [vmem:[%s4463_s1 + $0x18] sm:$0xff] }
  0xf7   : > { %v1067_v16 = vsel %vm1066_vm8, %v1065_v11, %v1060_v36  ;;  %774 = vadd.xlane.f32.xlu1 %v773_v8  ;;  %v731_v36 = vsel %vm493_vm0, %v444_v26, 0.0 }
  0xf8   : > { %v1599_v17 = vsel %vm1017_vm1, %v1598_v12, %v1594_v10  ;;  %729 = vadd.xlane.f32.xlu0 %v728_v9  ;;  %v613_v21 = vpop.xlane.xlu1 %612  ;;  %vm1670_vm1 = vcmask 1041409  }
  0xf9   : > { %v568_v22 = vpop.xlane.xlu0 %567  ;;  %v1233_v24 = vrot.slane %v613_v21, %v3355_v20 }
  0xfa   : > { %v1159_v28 = vrot.slane %v568_v22, %v3395_v2  ;;  %v491_v22 = vld [vmem:[%s3047_s17 + $0x3f0] sm:$0xff] }
  0xfb   : > { %v3416_v29 = vsel %vm1059_vm7, %v1233_v24, %v1229_v47  ;;  %864 = vadd.xlane.f32.xlu1 %v863_v23  ;;  %v866_v47 = vsel %vm493_vm0, %v489_v40, 0.0  ;;  %v492_v23 = vld [vmem:[%s3047_s17 + $0x3f8] sm:$0xff] }
  0xfc   : > { %v3420_v30 = vsel %vm1066_vm8, %v1159_v28, %v3367_v34  ;;  %819 = vadd.xlane.f32.xlu0 %v818_v27  ;;  %v703_v31 = vpop.xlane.xlu1 %702 }
  0xfd   : > { %v658_v32 = vpop.xlane.xlu0 %657  ;;  %v1381_v37 = vrot.slane %v703_v31, %v3284_v53  ;;  %v872_v31 = vsel %vm493_vm0, %v491_v22, 0.0 }
  0xfe   : > { %v1307_v39 = vrot.slane %v658_v32, %v3320_v38  ;;  %v875_v32 = vsel %vm493_vm0, %v492_v23, 0.0 }
  0xff   : > { %v3430_v34 = vsel %vm1045_vm5, %v1381_v37, %v1377_v59  ;;  %777 = vadd.xlane.f32.xlu1 %v776_v33  ;;  %v1075_v37 = vadd.s32 4294967216, %v3191_v15 }
 0x100   : > { %v3434_v43 = vsel %vm1052_vm6, %v1307_v39, %v3377_v46  ;;  %732 = vadd.xlane.f32.xlu0 %v731_v36  ;;  %v793_v44 = vpop.xlane.xlu1 %792  ;;  %v1692_v46 = vld [vmem:[%s4463_s1] sm:$0xff] }
 0x101   : > { %v748_v45 = vpop.xlane.xlu0 %747  ;;  %v1529_v49 = vrot.slane %v793_v44, %v3239_v61  ;;  %v2664_v59 = vpack.c.bf16 %v1693_v55, %v1692_v46 }
 0x102   : > { %v1455_v50 = vrot.slane %v748_v45, %v3257_v19 }
 0x103   : > { %v3452_v56 = vsel %vm1031_vm3, %v1529_v49, %v1525_v5  ;;  %867 = vadd.xlane.f32.xlu1 %v866_v47  ;;  %v476_v5 = vld [vmem:[%s3047_s17 + $0x378] sm:$0xff]  ;;  %2665 = vmatpush3.bf16.msra.mxu0 %v2664_v59 }
 0x104   : > { %v3456_v57 = vsel %vm1038_vm4, %v1455_v50, %v3388_v58  ;;  %822 = vadd.xlane.f32.xlu0 %v821_v48  ;;  %v523_v60 = vpop.xlane.xlu1 %522  ;;  %v490_v58 = vld [vmem:[%s3047_s17 + $0x3e8] sm:$0xff]  ;;  %2666 = vmatprep.subr.bf16.mxu0 %v2970_v1  ;;  %v827_v12 = vsel %vm493_vm0, %v476_v5, 0.0  ;;  %v3510_v48 = vsub.s32 %v1075_v37, %v3195_v18  ;;  %v1704_v5 = vld [vmem:[%s4463_s1 + $0x60] sm:$0xff] }
 0x105   : > { %v838_v62 = vpop.xlane.xlu0 %837  ;;  %v1072_v3 = vrot.slane %v523_v60, %v3441_v51  ;;  %v869_v13 = vsel %vm493_vm0, %v490_v58, 0.0  ;;  %v1702_v60 = vld [vmem:[%s4463_s1 + $0x50] sm:$0xff]  ;;  %v1705_v58 = vld [vmem:[%s4463_s1 + $0x68] sm:$0xff]  ;;  %vm1115_vm0 = vcmask 1048512  }
 0x106   : > { %v1603_v4 = vrot.slane %v838_v62, %v3215_v35  ;;  %v2667_v35 = vpack.c.bf16 %v1695_v7, %v1694_v6 }
 0x107   : > { %v1074_v8 = vsel %vm1073_vm9, %v1072_v3, %v1067_v16  ;;  %825 = vadd.xlane.f32.xlu1 %v824_v63  ;;  %v1696_v16 = vld [vmem:[%s4463_s1 + $0x20] sm:$0xff] }
 0x108   : > { %v1604_v9 = vsel %vm1024_vm2, %v1603_v4, %v1599_v17  ;;  %780 = vadd.xlane.f32.xlu0 %v779_v0  ;;  %v616_v10 = vpop.xlane.xlu1 %615  ;;  %2668 = vmatpush3.bf16.msra.mxu0 %v2667_v35  ;;  %v1697_v17 = vld [vmem:[%s4463_s1 + $0x28] sm:$0xff]  ;;  %vm1672_vm2 = vcmask 1042434  }
 0x109   : > { %v571_v11 = vpop.xlane.xlu0 %570  ;;  %v1238_v14 = vrot.slane %v616_v10, %v3395_v2  ;;  %2669 = vmatprep.subr.bf16.mxu0 %v2970_v1  ;;  %v2670_v28 = vpack.c.bf16 %v1697_v17, %v1696_v16 }
 0x10a   : > { %v1164_v21 = vrot.slane %v571_v11, %v3441_v51 }
 0x10b   : > { %v1239_v27 = vsel %vm1066_vm8, %v1238_v14, %v3416_v29  ;;  %828 = vadd.xlane.f32.xlu1 %v827_v12  ;;  %v1698_v29 = vld [vmem:[%s4463_s1 + $0x30] sm:$0xff]  ;;  %v1082_v12 = vadd.s32 4294967208, %v3191_v15  ;;  %v1707_v14 = vld [vmem:[%s4463_s1 + $0x78] sm:$0xff] }
 0x10c   : > { %v1165_v24 = vsel %vm1073_vm9, %v1164_v21, %v3420_v30  ;;  %870 = vadd.xlane.f32.xlu0 %v869_v13  ;;  %v706_v25 = vpop.xlane.xlu1 %705  ;;  %2671 = vmatpush3.bf16.msra.mxu0 %v2670_v28  ;;  %v1699_v30 = vld [vmem:[%s4463_s1 + $0x38] sm:$0xff]  ;;  %v1706_v13 = vld [vmem:[%s4463_s1 + $0x70] sm:$0xff]  ;;  %v2972_v28 = vmov 0.0  }
 0x10d   : > { %v661_v26 = vpop.xlane.xlu0 %660  ;;  %v1386_v33 = vrot.slane %v706_v25, %v3320_v38  ;;  %2672 = vmatprep.subr.bf16.mxu0 %v2970_v1  ;;  %v2673_v41 = vpack.c.bf16 %v1699_v30, %v1698_v29  ;;  %v2685_v23 = vpack.c.bf16 %v1707_v14, %v1706_v13  ;;  %2655 = vmatprep.mubr.msk.f32.mxu0 %vm2971_vm11, %v2972_v28 }
 0x10e   : > { %v1312_v36 = vrot.slane %v661_v26, %v3355_v20  ;;  %2658 = vmatprep.subr.mxu1 %v2972_v28  ;;  %2660 = vmatprep.mubr.msk.f32.mxu1 %vm2971_vm11, %v2972_v28 }
 0x10f   : > { %v1387_v39 = vsel %vm1052_vm6, %v1386_v33, %v3430_v34  ;;  %876 = vadd.xlane.f32.xlu1 %v875_v32  ;;  %v1700_v34 = vld [vmem:[%s4463_s1 + $0x40] sm:$0xff] }
 0x110   : > { %v1313_v40 = vsel %vm1059_vm7, %v1312_v36, %v3434_v43  ;;  %873 = vadd.xlane.f32.xlu0 %v872_v31  ;;  %v796_v42 = vpop.xlane.xlu1 %795  ;;  %2674 = vmatpush3.bf16.msra.mxu0 %v2673_v41  ;;  %v1701_v43 = vld [vmem:[%s4463_s1 + $0x48] sm:$0xff] }
 0x111   : > { %v751_v44 = vpop.xlane.xlu0 %750  ;;  %v1534_v45 = vrot.slane %v796_v42, %v3257_v19  ;;  %2675 = vmatprep.subr.bf16.mxu0 %v2970_v1  ;;  %v2676_v52 = vpack.c.bf16 %v1701_v43, %v1700_v34  ;;  %v1089_v43 = vadd.s32 4294967200, %v3191_v15 }
 0x112   : > { %v1460_v47 = vrot.slane %v751_v44, %v3284_v53 }
 0x113   : > { %v1535_v49 = vsel %vm1038_vm4, %v1534_v45, %v3452_v56  ;;  %v1703_v56 = vld [vmem:[%s4463_s1 + $0x58] sm:$0xff] }
 0x114   : > { %v1461_v50 = vsel %vm1045_vm5, %v1460_v47, %v3456_v57  ;;  %v526_v54 = vpop.xlane.xlu1 %525  ;;  %2677 = vmatpush3.bf16.msra.mxu0 %v2676_v52  ;;  %v2679_v63 = vpack.c.bf16 %v1703_v56, %v1702_v60 }
 0x115   : > { %v841_v46 = vpop.xlane.xlu0 %840  ;;  %v1079_v55 = vrot.slane %v526_v54, %v3510_v48  ;;  %2678 = vmatprep.subr.bf16.mxu0 %v2970_v1 }
 0x116   : > { %v1608_v59 = vrot.slane %v841_v46, %v3239_v61 }
 0x117   : > { %v1081_v57 = vsel %vm1080_vm10, %v1079_v55, %v1074_v8  ;;  %v2682_v8 = vpack.c.bf16 %v1705_v58, %v1704_v5 }
 0x118   : > { %v1609_v62 = vsel %vm1031_vm3, %v1608_v59, %v1604_v9  ;;  %v619_v0 = vpop.xlane.xlu1 %618  ;;  %2680 = vmatpush3.bf16.msra.mxu0 %v2679_v63  ;;  %v3583_v59 = vsub.s32 %v1089_v43, %v3195_v18  ;;  %vm1674_vm3 = vcmask 1043459  }
 0x119   : > { %v574_v3 = vpop.xlane.xlu0 %573  ;;  %v1243_v61 = vrot.slane %v619_v0, %v3441_v51  ;;  %2681 = vmatprep.subr.bf16.mxu0 %v2970_v1 }
 0x11a   : > { %v1169_v4 = vrot.slane %v574_v3, %v3510_v48 }
 0x11b   : > { %v1244_v6 = vsel %vm1073_vm9, %v1243_v61, %v1239_v27 }
 0x11c   : > { %v1170_v7 = vsel %vm1080_vm10, %v1169_v4, %v1165_v24  ;;  %v709_v9 = vpop.xlane.xlu1 %708  ;;  %2683 = vmatpush3.bf16.msra.mxu0 %v2682_v8 }
 0x11d   : > { %v664_v35 = vpop.xlane.xlu0 %663  ;;  %v1391_v10 = vrot.slane %v709_v9, %v3355_v20  ;;  %2684 = vmatprep.subr.bf16.mxu0 %v2970_v1  ;;  %v3560_v1 = vsub.s32 %v1082_v12, %v3195_v18 }
 0x11e   : > { %v1317_v11 = vrot.slane %v664_v35, %v3395_v2 }
 0x11f   : > { %v1392_v21 = vsel %vm1059_vm7, %v1391_v10, %v1387_v39 }
 0x120   : > { %v1318_v22 = vsel %vm1066_vm8, %v1317_v11, %v1313_v40  ;;  %v799_v16 = vpop.xlane.xlu1 %798  ;;  %2686 = vmatpush3.bf16.msra.mxu0 %v2685_v23  ;;  %v1096_v11 = vadd.s32 4294967192, %v3191_v15 }
 0x121   : > { %v754_v17 = vpop.xlane.xlu0 %753  ;;  %v1539_v27 = vrot.slane %v799_v16, %v3284_v53 }
 0x122   : > { %v1465_v24 = vrot.slane %v754_v17, %v3320_v38  ;;  %v3603_v16 = vsub.s32 %v1096_v11, %v3195_v18 }
 0x123   : > { %v1540_v25 = vsel %vm1045_vm5, %v1539_v27, %v1535_v49 }
 0x124   : > { %v1466_v26 = vsel %vm1052_vm6, %v1465_v24, %v1461_v50  ;;  %v529_v31 = vpop.xlane.xlu1 %528 }
 0x125   : > { %v844_v32 = vpop.xlane.xlu0 %843  ;;  %v1086_v33 = vrot.slane %v529_v31, %v3560_v1 }
 0x126   : > { %v1613_v36 = vrot.slane %v844_v32, %v3257_v19 }
 0x127   : > { %v1088_v37 = vsel %vm1087_vm12, %v1086_v33, %v1081_v57 }
 0x128   : > { %v1614_v29 = vsel %vm1038_vm4, %v1613_v36, %v1609_v62  ;;  %v622_v30 = vpop.xlane.xlu1 %621  ;;  %vm1676_vm4 = vcmask 1044484  }
 0x129   : > { %v577_v39 = vpop.xlane.xlu0 %576  ;;  %v1248_v40 = vrot.slane %v622_v30, %v3510_v48 }
 0x12a   : > { %v1174_v41 = vrot.slane %v577_v39, %v3560_v1 }
 0x12b   : > { %v1249_v42 = vsel %vm1080_vm10, %v1248_v40, %v1244_v6 }
 0x12c   : > { %v1175_v44 = vsel %vm1087_vm12, %v1174_v41, %v1170_v7  ;;  %v712_v45 = vpop.xlane.xlu1 %711 }
 0x12d   : > { %v667_v47 = vpop.xlane.xlu0 %666  ;;  %v1396_v34 = vrot.slane %v712_v45, %v3395_v2  ;;  %v1103_v45 = vadd.s32 4294967184, %v3191_v15 }
 0x12e   : > { %v1322_v19 = vrot.slane %v667_v47, %v3441_v51 }
 0x12f   : > { %v1397_v49 = vsel %vm1066_vm8, %v1396_v34, %v1392_v21 }
 0x130   : > { %v1323_v50 = vsel %vm1073_vm9, %v1322_v19, %v1318_v22  ;;  %v802_v52 = vpop.xlane.xlu1 %801 }
 0x131   : > { %v757_v54 = vpop.xlane.xlu0 %756  ;;  %v1544_v46 = vrot.slane %v802_v52, %v3320_v38  ;;  %v3625_v52 = vsub.s32 %v1103_v45, %v3195_v18 }
 0x132   : > { %v1470_v55 = vrot.slane %v757_v54, %v3355_v20 }
 0x133   : > { %v1545_v60 = vsel %vm1052_vm6, %v1544_v46, %v1540_v25 }
 0x134   : > { %v1471_v56 = vsel %vm1059_vm7, %v1470_v55, %v1466_v26  ;;  %v532_v57 = vpop.xlane.xlu1 %531 }
 0x135   : > { %v847_v62 = vpop.xlane.xlu0 %846  ;;  %v1093_v63 = vrot.slane %v532_v57, %v3583_v59 }
 0x136   : > { %v1618_v0 = vrot.slane %v847_v62, %v3284_v53 }
 0x137   : > { %v1095_v3 = vsel %vm1094_vm13, %v1093_v63, %v1088_v37 }
 0x138   : > { %v1619_v61 = vsel %vm1045_vm5, %v1618_v0, %v1614_v29  ;;  %v625_v4 = vpop.xlane.xlu1 %624  ;;  %vm1678_vm5 = vcmask 1045509  }
 0x139   : > { %v580_v5 = vpop.xlane.xlu0 %579  ;;  %v1253_v58 = vrot.slane %v625_v4, %v3560_v1 }
 0x13a   : > { %v1179_v6 = vrot.slane %v580_v5, %v3583_v59  ;;  %v1110_v5 = vadd.s32 4294967176, %v3191_v15 }
 0x13b   : > { %v1254_v7 = vsel %vm1087_vm12, %v1253_v58, %v1249_v42 }
 0x13c   : > { %v1180_v8 = vsel %vm1094_vm13, %v1179_v6, %v1175_v44  ;;  %v715_v9 = vpop.xlane.xlu1 %714 }
 0x13d   : > { %v670_v35 = vpop.xlane.xlu0 %669  ;;  %v1401_v10 = vrot.slane %v715_v9, %v3441_v51 }
 0x13e   : > { %v1327_v53 = vrot.slane %v670_v35, %v3510_v48 }
 0x13f   : > { %v1402_v12 = vsel %vm1073_vm9, %v1401_v10, %v1397_v49 }
 0x140   : > { %v1328_v13 = vsel %vm1080_vm10, %v1327_v53, %v1323_v50  ;;  %v805_v14 = vpop.xlane.xlu1 %804 }
 0x141   : > { %v760_v21 = vpop.xlane.xlu0 %759  ;;  %v1549_v22 = vrot.slane %v805_v14, %v3355_v20 }
 0x142   : > { %v1475_v23 = vrot.slane %v760_v21, %v3395_v2 }
 0x143   : > { %v1550_v17 = vsel %vm1059_vm7, %v1549_v22, %v1545_v60 }
 0x144   : > { %v1476_v27 = vsel %vm1066_vm8, %v1475_v23, %v1471_v56  ;;  %v535_v24 = vpop.xlane.xlu1 %534 }
 0x145   : > { %v850_v25 = vpop.xlane.xlu0 %849  ;;  %v1100_v26 = vrot.slane %v535_v24, %v3603_v16 }
 0x146   : > { %v1623_v31 = vrot.slane %v850_v25, %v3320_v38 }
 0x147   : > { %v1102_v32 = vsel %vm1101_vm14, %v1100_v26, %v1095_v3 }
 0x148   : > { %v1624_v33 = vsel %vm1052_vm6, %v1623_v31, %v1619_v61  ;;  %v628_v36 = vpop.xlane.xlu1 %627  ;;  %vm1680_vm6 = vcmask 1046534  }
 0x149   : > { %v583_v37 = vpop.xlane.xlu0 %582  ;;  %v1258_v29 = vrot.slane %v628_v36, %v3583_v59 }
 0x14a   : > { %v1184_v30 = vrot.slane %v583_v37, %v3603_v16 }
 0x14b   : > { %v1259_v39 = vsel %vm1094_vm13, %v1258_v29, %v1254_v7  ;;  %v3645_v7 = vsub.s32 %v1110_v5, %v3195_v18 }
 0x14c   : > { %v1185_v40 = vsel %vm1101_vm14, %v1184_v30, %v1180_v8  ;;  %v718_v41 = vpop.xlane.xlu1 %717 }
 0x14d   : > { %v673_v42 = vpop.xlane.xlu0 %672  ;;  %v1406_v44 = vrot.slane %v718_v41, %v3510_v48 }
 0x14e   : > { %v1332_v38 = vrot.slane %v673_v42, %v3560_v1 }
 0x14f   : > { %v3619_v47 = vsel %vm1080_vm10, %v1406_v44, %v1402_v12 }
 0x150   : > { %v1333_v34 = vsel %vm1087_vm12, %v1332_v38, %v1328_v13  ;;  %v808_v19 = vpop.xlane.xlu1 %807 }
 0x151   : > { %v763_v43 = vpop.xlane.xlu0 %762  ;;  %v1554_v49 = vrot.slane %v808_v19, %v3395_v2 }
 0x152   : > { %v1480_v50 = vrot.slane %v763_v43, %v3441_v51 }
 0x153   : > { %v3628_v54 = vsel %vm1066_vm8, %v1554_v49, %v1550_v17 }
 0x154   : > { %v3631_v46 = vsel %vm1073_vm9, %v1480_v50, %v1476_v27  ;;  %v538_v55 = vpop.xlane.xlu1 %537 }
 0x155   : > { %v853_v60 = vpop.xlane.xlu0 %852  ;;  %v1107_v56 = vrot.slane %v538_v55, %v3625_v52 }
 0x156   : > { %v1628_v57 = vrot.slane %v853_v60, %v3355_v20 }
 0x157   : > { %v1109_v62 = vsel %vm1108_vm15, %v1107_v56, %v1102_v32 }
 0x158   : > { %v3637_v63 = vsel %vm1059_vm7, %v1628_v57, %v1624_v33  ;;  %v631_v0 = vpop.xlane.xlu1 %630  ;;  %vm1682_vm7 = vcmask 1047559  }
 0x159   : > { %v586_v3 = vpop.xlane.xlu0 %585  ;;  %v1263_v27 = vrot.slane %v631_v0, %v3603_v16 }
 0x15a   : > { %v1189_v9 = vrot.slane %v586_v3, %v3625_v52 }
 0x15b   : > { %v1264_v31 = vsel %vm1101_vm14, %v1263_v27, %v1259_v39 }
 0x15c   : > { %v721_v61 = vpop.xlane.xlu1 %720  ;;  %v1190_v11 = vsel %vm1108_vm15, %v1189_v9, %v1185_v40 }
 0x15d   : > { %v676_v4 = vpop.xlane.xlu0 %675 }
 0x15e   : > { %v1337_v40 = vrot.slane %v676_v4, %v3583_v59 }
 0x160   : > { %v3640_v58 = vpop.xlane.xlu1 %810  ;;  %v1338_v39 = vsel %vm1094_vm13, %v1337_v40, %v1333_v34 }
 0x161   : > { %v3642_v6 = vpop.xlane.xlu0 %765 }
 0x164   : > { %v541_v8 = vpop.xlane.xlu1 %540 }
 0x165   : > { %v3647_v20 = vpop.xlane.xlu0 %855  ;;  %v1114_v35 = vrot.slane %v541_v8, %v3645_v7 }
 0x167   : > { %v1116_v12 = vsel %vm1115_vm0, %v1114_v35, %v1109_v62  ;;  %v1411_v62 = vrot.slane %v721_v61, %v3560_v1 }
 0x168   : > { %v634_v10 = vpop.xlane.xlu1 %633 }
 0x169   : > { %v589_v53 = vpop.xlane.xlu0 %588  ;;  %v1268_v24 = vrot.slane %v634_v10, %v3625_v52  ;;  %v1412_v8 = vsel %vm1087_vm12, %v1411_v62, %v3619_v47  ;;  %v1559_v47 = vrot.slane %v3640_v58, %v3441_v51 }
 0x16a   : > { %v1194_v15 = vrot.slane %v589_v53, %v3645_v7 }
 0x16b   : > { %v1269_v33 = vsel %vm1108_vm15, %v1268_v24, %v1264_v31  ;;  %v1560_v58 = vsel %vm1073_vm9, %v1559_v47, %v3628_v54 }
 0x16c   : > { %v1195_v13 = vsel %vm1115_vm0, %v1194_v15, %v1190_v11  ;;  %v724_v21 = vpop.xlane.xlu1 %723  ;;  %v1485_v15 = vrot.slane %v3642_v6, %v3510_v48 }
 0x16d   : > { %v1671_v14 = vsel %vm1670_vm1, %v1195_v13, %v1116_v12  ;;  %v679_v22 = vpop.xlane.xlu0 %678  ;;  %v1416_v0 = vrot.slane %v724_v21, %v3583_v59 }
 0x16e   : > { %v1342_v44 = vrot.slane %v679_v22, %v3603_v16 }
 0x16f   : > { %v1417_v9 = vsel %vm1094_vm13, %v1416_v0, %v1412_v8 }
 0x170   : > { %v3655_v23 = vpop.xlane.xlu1 %813  ;;  %v1343_v43 = vsel %vm1101_vm14, %v1342_v44, %v1338_v39 }
 0x171   : > { %v769_v17 = vpop.xlane.xlu0 %768  ;;  %v1564_v6 = vrot.slane %v3655_v23, %v3510_v48 }
 0x172   : > { %v1490_v12 = vrot.slane %v769_v17, %v3560_v1 }
 0x174   : > { %v637_v25 = vpop.xlane.xlu1 %636 }
 0x175   : > { %v3659_v26 = vpop.xlane.xlu0 %858  ;;  %v1273_v32 = vrot.slane %v637_v25, %v3645_v7  ;;  %v1486_v25 = vsel %vm1080_vm10, %v1485_v15, %v3631_v46  ;;  %v1633_v46 = vrot.slane %v3647_v20, %v3395_v2  ;;  %v1865_v15 = vld [vmem:[%s4465_s3 + $0x20] sm:$0xff] }
 0x176   : > { %v1491_v31 = vsel %vm1087_vm12, %v1490_v12, %v1486_v25  ;;  %v1638_v54 = vrot.slane %v3659_v26, %v3441_v51 }
 0x177   : > { %v1274_v36 = vsel %vm1115_vm0, %v1273_v32, %v1269_v33  ;;  %v1634_v51 = vsel %vm1066_vm8, %v1633_v46, %v3637_v63  ;;  %vm1780_vm8 = vcmask 64512   ;;  %v1885_v46 = vld [vmem:[%s4465_s3 + $0xc0] sm:$0xff] }
 0x178   : > { %v1673_v37 = vsel %vm1672_vm2, %v1274_v36, %v1671_v14  ;;  %v727_v29 = vpop.xlane.xlu1 %726 }
 0x179   : > { %v682_v30 = vpop.xlane.xlu0 %681  ;;  %v1421_v4 = vrot.slane %v727_v29, %v3603_v16 }
 0x17a   : > { %v1347_v38 = vrot.slane %v682_v30, %v3625_v52 }
 0x17b   : > { %v1422_v53 = vsel %vm1101_vm14, %v1421_v4, %v1417_v9 }
 0x17c   : > { %v817_v41 = vpop.xlane.xlu1 %816  ;;  %v1348_v50 = vsel %vm1108_vm15, %v1347_v38, %v1343_v43 }
 0x17d   : > { %v772_v42 = vpop.xlane.xlu0 %771  ;;  %v1569_v32 = vrot.slane %v817_v41, %v3560_v1  ;;  %v1565_v41 = vsel %vm1080_vm10, %v1564_v6, %v1560_v58  ;;  %v1878_v6 = vld [vmem:[%s4465_s3 + $0x88] sm:$0xff]  ;;  %v1881_v58 = vld [vmem:[%s4465_s3 + $0xa0] sm:$0xff] }
 0x17e   : > { %v1495_v14 = vrot.slane %v772_v42, %v3583_v59 }
 0x17f   : > { %v1570_v38 = vsel %vm1087_vm12, %v1569_v32, %v1565_v41  ;;  %v1877_v32 = vld [vmem:[%s4465_s3 + $0x80] sm:$0xff]  ;;  %v1898_v41 = vld [vmem:[%s4465_s3 + $0x128] sm:$0xff] }
 0x180   : > { %v685_v45 = vpop.xlane.xlu1 %684  ;;  %v1496_v33 = vsel %vm1094_vm13, %v1495_v14, %v1491_v31  ;;  %v1870_v14 = vld [vmem:[%s4465_s3 + $0x48] sm:$0xff] }
 0x181   : > { %v3669_v19 = vpop.xlane.xlu0 %861  ;;  %v1352_v49 = vrot.slane %v685_v45, %v3645_v7 }
 0x182   : > { %v1643_v2 = vrot.slane %v3669_v19, %v3510_v48  ;;  %v1639_v48 = vsel %vm1073_vm9, %v1638_v54, %v1634_v51  ;;  %v1914_v51 = vld [vmem:[%s4465_s3 + $0x1a8] sm:$0xff] }
 0x183   : > { %v1353_v55 = vsel %vm1115_vm0, %v1352_v49, %v1348_v50 }
 0x184   : > { %v1675_v60 = vsel %vm1674_vm3, %v1353_v55, %v1673_v37  ;;  %v775_v56 = vpop.xlane.xlu1 %774 }
 0x185   : > { %v730_v57 = vpop.xlane.xlu0 %729  ;;  %v1500_v24 = vrot.slane %v775_v56, %v3603_v16  ;;  %v1644_v56 = vsel %vm1080_vm10, %v1643_v2, %v1639_v48  ;;  %v1902_v2 = vld [vmem:[%s4465_s3 + $0x148] sm:$0xff] }
 0x186   : > { %v1426_v5 = vrot.slane %v730_v57, %v3625_v52  ;;  %v1918_v48 = vld [vmem:[%s4465_s3 + $0x1c8] sm:$0xff] }
 0x187   : > { %v1501_v23 = vsel %vm1101_vm14, %v1500_v24, %v1496_v33  ;;  %v1873_v24 = vld [vmem:[%s4465_s3 + $0x60] sm:$0xff]  ;;  %v2697_v33 = vpack.c.bf16 %v1881_v58, %v1877_v32 }
 0x188   : > { %v865_v34 = vpop.xlane.xlu1 %864  ;;  %v1427_v11 = vsel %vm1108_vm15, %v1426_v5, %v1422_v53  ;;  %v1861_v53 = vld [vmem:[%s4465_s3] sm:$0xff] }
 0x189   : > { %v820_v3 = vpop.xlane.xlu0 %819  ;;  %v1648_v39 = vrot.slane %v865_v34, %v3560_v1 }
 0x18a   : > { %v1574_v36 = vrot.slane %v820_v3, %v3583_v59 }
 0x18b   : > { %v1649_v62 = vsel %vm1087_vm12, %v1648_v39, %v1644_v56 }
 0x18c   : > { %v778_v35 = vpop.xlane.xlu1 %777  ;;  %v1575_v45 = vsel %vm1094_vm13, %v1574_v36, %v1570_v38  ;;  %v1886_v36 = vld [vmem:[%s4465_s3 + $0xc8] sm:$0xff] }
 0x18d   : > { %v733_v10 = vpop.xlane.xlu0 %732  ;;  %v1505_v17 = vrot.slane %v778_v35, %v3625_v52 }
 0x18e   : > { %v1431_v61 = vrot.slane %v733_v10, %v3645_v7  ;;  %v1866_v10 = vld [vmem:[%s4465_s3 + $0x28] sm:$0xff] }
 0x18f   : > { %v1506_v42 = vsel %vm1108_vm15, %v1505_v17, %v1501_v23  ;;  %v1882_v17 = vld [vmem:[%s4465_s3 + $0xa8] sm:$0xff]  ;;  %v1889_v23 = vld [vmem:[%s4465_s3 + $0xe0] sm:$0xff] }
 0x190   : > { %v1432_v13 = vsel %vm1115_vm0, %v1431_v61, %v1427_v11  ;;  %v868_v22 = vpop.xlane.xlu1 %867  ;;  %v2689_v11 = vpack.c.bf16 %v1865_v15, %v1861_v53  ;;  %v2695_v31 = vpack.c.bf16 %v1882_v17, %v1878_v6  ;;  %v2097_v53 = vld [vmem:[%s4467_s5 + $0x20] sm:$0xff]  ;;  %v2102_v15 = vld [vmem:[%s4467_s5 + $0x48] sm:$0xff]  ;;  %v2107_v6 = vld [vmem:[%s4467_s5 + $0x70] sm:$0xff] }
 0x191   : > { %v1677_v21 = vsel %vm1676_vm4, %v1432_v13, %v1675_v60  ;;  %v823_v27 = vpop.xlane.xlu0 %822  ;;  %v1653_v26 = vrot.slane %v868_v22, %v3583_v59  ;;  %v2110_v17 = vld [vmem:[%s4467_s5 + $0x88] sm:$0xff] }
 0x192   : > { %v1579_v30 = vrot.slane %v823_v27, %v3603_v16  ;;  %v1869_v27 = vld [vmem:[%s4465_s3 + $0x40] sm:$0xff] }
 0x193   : > { %v1654_v59 = vsel %vm1094_vm13, %v1653_v26, %v1649_v62  ;;  %v2693_v25 = vpack.c.bf16 %v1873_v24, %v1869_v27  ;;  %v1909_v26 = vld [vmem:[%s4465_s3 + $0x180] sm:$0xff] }
 0x194   : > { %v826_v37 = vpop.xlane.xlu1 %825  ;;  %v1580_v55 = vsel %vm1101_vm14, %v1579_v30, %v1575_v45  ;;  %v2701_v30 = vpack.c.bf16 %v1889_v23, %v1885_v46  ;;  %v1901_v45 = vld [vmem:[%s4465_s3 + $0x140] sm:$0xff] }
 0x195   : > { %v781_v29 = vpop.xlane.xlu0 %780  ;;  %v1584_v44 = vrot.slane %v826_v37, %v3625_v52  ;;  %v1890_v37 = vld [vmem:[%s4465_s3 + $0xe8] sm:$0xff]  ;;  %v1921_v62 = vld [vmem:[%s4465_s3 + $0x1e0] sm:$0xff] }
 0x196   : > { %v1510_v40 = vrot.slane %v781_v29, %v3645_v7  ;;  %v2699_v29 = vpack.c.bf16 %v1890_v37, %v1886_v36  ;;  %v2111_v36 = vld [vmem:[%s4467_s5 + $0x90] sm:$0xff]  ;;  %v2114_v37 = vld [vmem:[%s4467_s5 + $0xa8] sm:$0xff] }
 0x197   : > { %v1585_v19 = vsel %vm1108_vm15, %v1584_v44, %v1580_v55  ;;  %v1897_v44 = vld [vmem:[%s4465_s3 + $0x120] sm:$0xff] }
 0x198   : > { %v1511_v20 = vsel %vm1115_vm0, %v1510_v40, %v1506_v42  ;;  %v829_v49 = vpop.xlane.xlu1 %828  ;;  %v1894_v40 = vld [vmem:[%s4465_s3 + $0x108] sm:$0xff]  ;;  %v1893_v42 = vld [vmem:[%s4465_s3 + $0x100] sm:$0xff] }
 0x199   : > { %v1679_v43 = vsel %vm1678_vm5, %v1511_v20, %v1677_v21  ;;  %v871_v50 = vpop.xlane.xlu0 %870  ;;  %v1589_v60 = vrot.slane %v829_v49, %v3645_v7  ;;  %v1874_v21 = vld [vmem:[%s4465_s3 + $0x68] sm:$0xff]  ;;  %v2703_v54 = vpack.c.bf16 %v1898_v41, %v1894_v40  ;;  %v2705_v38 = vpack.c.bf16 %v1897_v44, %v1893_v42  ;;  %v2115_v40 = vld [vmem:[%s4467_s5 + $0xb0] sm:$0xff] }
 0x19a   : > { %v1658_v1 = vrot.slane %v871_v50, %v3603_v16  ;;  %v2691_v22 = vpack.c.bf16 %v1874_v21, %v1870_v14  ;;  %v1906_v20 = vld [vmem:[%s4465_s3 + $0x168] sm:$0xff]  ;;  %v2103_v14 = vld [vmem:[%s4467_s5 + $0x50] sm:$0xff] }
 0x19b   : > { %v1590_v57 = vsel %vm1115_vm0, %v1589_v60, %v1585_v19  ;;  %v2707_v39 = vpack.c.bf16 %v1906_v20, %v1902_v2  ;;  %v1910_v50 = vld [vmem:[%s4465_s3 + $0x188] sm:$0xff]  ;;  %v1913_v60 = vld [vmem:[%s4465_s3 + $0x1a0] sm:$0xff]  ;;  %v2119_v2 = vld [vmem:[%s4467_s5 + $0xd0] sm:$0xff] }
 0x19c   : > { %v877_v63 = vpop.xlane.xlu1 %876  ;;  %v1681_v34 = vsel %vm1680_vm6, %v1590_v57, %v1679_v43  ;;  %v1659_v5 = vsel %vm1101_vm14, %v1658_v1, %v1654_v59  ;;  %v1905_v43 = vld [vmem:[%s4465_s3 + $0x160] sm:$0xff]  ;;  %v2711_v55 = vpack.c.bf16 %v1914_v51, %v1910_v50  ;;  %v1922_v19 = vld [vmem:[%s4465_s3 + $0x1e8] sm:$0xff]  ;;  %v2713_v1 = vpack.c.bf16 %v1913_v60, %v1909_v26  ;;  %v2123_v50 = vld [vmem:[%s4467_s5 + $0xf0] sm:$0xff] }
 0x19d   : > { %v874_v0 = vpop.xlane.xlu0 %873  ;;  %v1668_v4 = vrot.slane %v877_v63, %v3645_v7  ;;  %v1862_v7 = vld [vmem:[%s4465_s3 + $0x8] sm:$0xff]  ;;  %v2709_v49 = vpack.c.bf16 %v1905_v43, %v1901_v45  ;;  %v2715_v56 = vpack.c.bf16 %v1922_v19, %v1918_v48  ;;  %v1917_v57 = vld [vmem:[%s4465_s3 + $0x1c0] sm:$0xff]  ;;  %v1868_v63 = vld [vmem:[%s4465_s3 + $0x38] sm:$0xff] }
 0x19e   : > { %v1663_v3 = vrot.slane %v874_v0, %v3625_v52  ;;  %v1779_v52 = vld [vmem:[%s4464_s2] sm:$0xff]  ;;  %v2687_v61 = vpack.c.bf16 %v1866_v10, %v1862_v7  ;;  %v1864_v0 = vld [vmem:[%s4465_s3 + $0x18] sm:$0xff]  ;;  %v2106_v21 = vld [vmem:[%s4467_s5 + $0x68] sm:$0xff] }
 0x19f   : > { %2659 = vmatpush3.msra.mxu1 %v1779_v52  ;;  %v2719_v59 = vpack.c.bf16 %v1868_v63, %v1864_v0  ;;  %v2100_v52 = vld [vmem:[%s4467_s5 + $0x38] sm:$0xff]  ;;  %v2118_v41 = vld [vmem:[%s4467_s5 + $0xc8] sm:$0xff]  ;;  %v2125_v48 = vld [vmem:[%s4467_s5 + $0x100] sm:$0xff] }
 0x1a0   : > { %v1664_v16 = vsel %vm1108_vm15, %v1663_v3, %v1659_v5  ;;  %2688 = vmatprep.subr.bf16.mxu0 %v2687_v61  ;;  %v2094_v3 = vld [vmem:[%s4467_s5 + $0x8] sm:$0xff]  ;;  %v2093_v5 = vld [vmem:[%s4467_s5] sm:$0xff]  ;;  %v2099_v61 = vld [vmem:[%s4467_s5 + $0x30] sm:$0xff] }
 0x1a1   : > { %v1669_v8 = vsel %vm1115_vm0, %v1668_v4, %v1664_v16  ;;  %v2096_v4 = vld [vmem:[%s4467_s5 + $0x18] sm:$0xff]  ;;  %v2122_v20 = vld [vmem:[%s4467_s5 + $0xe8] sm:$0xff]  ;;  %v2127_v19 = vld [vmem:[%s4467_s5 + $0x110] sm:$0xff] }
 0x1a2   : > { %v1683_v9 = vsel %vm1682_vm7, %v1669_v8, %v1681_v34  ;;  %v2717_v34 = vpack.c.bf16 %v1921_v62, %v1917_v57  ;;  %v2751_v16 = vpack.c.bf16 %v2096_v4, %v2094_v3  ;;  %v2095_v8 = vld [vmem:[%s4467_s5 + $0x10] sm:$0xff]  ;;  %v2126_v51 = vld [vmem:[%s4467_s5 + $0x108] sm:$0xff]  ;;  %v2128_v26 = vld [vmem:[%s4467_s5 + $0x118] sm:$0xff]  ;;  %v2785_v57 = vpack.c.bf16 %v2127_v19, %v2125_v48 }
 0x1a3   : > { %v3737_v35 = vmul.f32 0.015625, %v1683_v9  ;;  %v2098_v9 = vld [vmem:[%s4467_s5 + $0x28] sm:$0xff]  ;;  %v2753_v7 = vpack.c.bf16 %v2095_v8, %v2093_v5  ;;  %v2783_v60 = vpack.c.bf16 %v2128_v26, %v2126_v51  ;;  %v2129_v0 = vld [vmem:[%s4467_s5 + $0x120] sm:$0xff]  ;;  %v2131_v63 = vld [vmem:[%s4467_s5 + $0x130] sm:$0xff] }
 0x1a4   : > { %v2755_v10 = vpack.c.bf16 %v2100_v52, %v2098_v9  ;;  %2752 = vmatprep.subr.bf16.mxu1 %v2751_v16  ;;  %v2789_v3 = vpack.c.bf16 %v2131_v63, %v2129_v0  ;;  %v2133_v5 = vld [vmem:[%s4467_s5 + $0x140] sm:$0xff]  ;;  %v2135_v16 = vld [vmem:[%s4467_s5 + $0x150] sm:$0xff]  ;;  %v2138_v8 = vld [vmem:[%s4467_s5 + $0x168] sm:$0xff] }
 0x1a5   : > { %2656 = vmatmul.mubr.f32.vlgmr.msra.gmra.mrb[0].mxu0 %v3737_v35  ;;  %v2140_v9 = vld [vmem:[%s4467_s5 + $0x178] sm:$0xff]  ;;  %v2793_v52 = vpack.c.bf16 %v2135_v16, %v2133_v5  ;;  %v1879_v51 = vld [vmem:[%s4465_s3 + $0x90] sm:$0xff] }
 0x1a6   : > { %2011 = vmatprep.mubr.f32.mxu0 %v2972_v28  ;;  %2690 = vmatpush1.bf16.msra.mxu0 %v2689_v11  ;;  %v2104_v11 = vld [vmem:[%s4467_s5 + $0x58] sm:$0xff]  ;;  %v1883_v26 = vld [vmem:[%s4465_s3 + $0xb0] sm:$0xff] }
 0x1a7   : > { %2692 = vmatprep.subr.bf16.mxu0 %v2691_v22  ;;  %v2108_v22 = vld [vmem:[%s4467_s5 + $0x78] sm:$0xff]  ;;  %v1887_v19 = vld [vmem:[%s4465_s3 + $0xd0] sm:$0xff] }
 0x1a8   : > { %v2763_v24 = vpack.c.bf16 %v2108_v22, %v2106_v21  ;;  %v2148_v21 = vld [vmem:[%s4467_s5 + $0x1b8] sm:$0xff]  ;;  %v1895_v63 = vld [vmem:[%s4465_s3 + $0x110] sm:$0xff] }
 0x1a9   : > { %v1903_v16 = vld [vmem:[%s4465_s3 + $0x150] sm:$0xff] }
 0x1aa   : > { %2694 = vmatpush1.bf16.msra.mxu0 %v2693_v25  ;;  %v2105_v25 = vld [vmem:[%s4467_s5 + $0x60] sm:$0xff] }
 0x1ab   : > { %2696 = vmatprep.subr.bf16.mxu0 %v2695_v31  ;;  %v2112_v31 = vld [vmem:[%s4467_s5 + $0x98] sm:$0xff]  ;;  %v2765_v32 = vpack.c.bf16 %v2107_v6, %v2105_v25  ;;  %v2147_v25 = vld [vmem:[%s4467_s5 + $0x1b0] sm:$0xff]  ;;  %v2150_v6 = vld [vmem:[%s4467_s5 + $0x1c8] sm:$0xff] }
 0x1ac   : > { %v2767_v58 = vpack.c.bf16 %v2112_v31, %v2110_v17  ;;  %v2152_v17 = vld [vmem:[%s4467_s5 + $0x1d8] sm:$0xff] }
 0x1ae   : > { %2698 = vmatpush1.bf16.msra.mxu0 %v2697_v33  ;;  %v2109_v33 = vld [vmem:[%s4467_s5 + $0x80] sm:$0xff] }
 0x1af   : > { %2700 = vmatprep.subr.bf16.mxu0 %v2699_v29  ;;  %v2116_v29 = vld [vmem:[%s4467_s5 + $0xb8] sm:$0xff]  ;;  %v2769_v46 = vpack.c.bf16 %v2111_v36, %v2109_v33  ;;  %v2151_v33 = vld [vmem:[%s4467_s5 + $0x1d0] sm:$0xff] }
 0x1b0   : > { %v2771_v23 = vpack.c.bf16 %v2116_v29, %v2114_v37 }
 0x1b2   : > { %2702 = vmatpush1.bf16.msra.mxu0 %v2701_v30  ;;  %v2113_v30 = vld [vmem:[%s4467_s5 + $0xa0] sm:$0xff] }
 0x1b3   : > { %2704 = vmatprep.subr.bf16.mxu0 %v2703_v54  ;;  %v2120_v54 = vld [vmem:[%s4467_s5 + $0xd8] sm:$0xff]  ;;  %v2773_v42 = vpack.c.bf16 %v2115_v40, %v2113_v30  ;;  %v1863_v40 = vld [vmem:[%s4465_s3 + $0x10] sm:$0xff] }
 0x1b4   : > { %v2775_v44 = vpack.c.bf16 %v2120_v54, %v2118_v41  ;;  %v1867_v41 = vld [vmem:[%s4465_s3 + $0x30] sm:$0xff]  ;;  %v1872_v54 = vld [vmem:[%s4465_s3 + $0x58] sm:$0xff] }
 0x1b6   : > { %2706 = vmatpush1.bf16.msra.mxu0 %v2705_v38  ;;  %v2117_v38 = vld [vmem:[%s4467_s5 + $0xc0] sm:$0xff] }
 0x1b7   : > { %2708 = vmatprep.subr.bf16.mxu0 %v2707_v39  ;;  %v2124_v39 = vld [vmem:[%s4467_s5 + $0xf8] sm:$0xff]  ;;  %v2777_v45 = vpack.c.bf16 %v2119_v2, %v2117_v38  ;;  %v2721_v38 = vpack.c.bf16 %v1867_v41, %v1863_v40 }
 0x1b8   : > { %v2779_v43 = vpack.c.bf16 %v2124_v39, %v2122_v20  ;;  %v1871_v39 = vld [vmem:[%s4465_s3 + $0x50] sm:$0xff] }
 0x1ba   : > { %2710 = vmatpush1.bf16.msra.mxu0 %v2709_v49  ;;  %v2121_v49 = vld [vmem:[%s4467_s5 + $0xe0] sm:$0xff] }
 0x1bb   : > { %2712 = vmatprep.subr.bf16.mxu0 %v2711_v55  ;;  %v2781_v55 = vpack.c.bf16 %v2123_v50, %v2121_v49  ;;  %v1884_v49 = vld [vmem:[%s4465_s3 + $0xb8] sm:$0xff] }
 0x1be   : > { %2714 = vmatpush1.bf16.msra.mxu0 %v2713_v1  ;;  %v2130_v1 = vld [vmem:[%s4467_s5 + $0x128] sm:$0xff] }
 0x1bf   : > { %2716 = vmatprep.subr.bf16.mxu0 %v2715_v56  ;;  %v2132_v56 = vld [vmem:[%s4467_s5 + $0x138] sm:$0xff] }
 0x1c0   : > { %v2787_v62 = vpack.c.bf16 %v2132_v56, %v2130_v1  ;;  %v1891_v1 = vld [vmem:[%s4465_s3 + $0xf0] sm:$0xff]  ;;  %v1896_v56 = vld [vmem:[%s4465_s3 + $0x118] sm:$0xff] }
 0x1c2   : > { %2718 = vmatpush1.bf16.msra.mxu0 %v2717_v34  ;;  %v2134_v34 = vld [vmem:[%s4467_s5 + $0x148] sm:$0xff] }
 0x1c3   : > { %2720 = vmatprep.subr.bf16.mxu0 %v2719_v59  ;;  %v2136_v59 = vld [vmem:[%s4467_s5 + $0x158] sm:$0xff] }
 0x1c4   : > { %v2791_v4 = vpack.c.bf16 %v2136_v59, %v2134_v34  ;;  %v1899_v34 = vld [vmem:[%s4465_s3 + $0x130] sm:$0xff]  ;;  %v1904_v59 = vld [vmem:[%s4465_s3 + $0x158] sm:$0xff] }
 0x278   : > { %v1774_v12 = vpop.f32.mrb[0].mxu0 }
 0x279   : > { %v1778_v13 = vmax.f32 %v1774_v12, 0.0  ;;  %v2657_v47 = vpop.f32.mrb[1].mxu0  ;;  %v2757_v12 = vpack.c.bf16 %v2099_v61, %v2097_v53  ;;  %v2139_v53 = vld [vmem:[%s4467_s5 + $0x170] sm:$0xff]  ;;  %v2142_v61 = vld [vmem:[%s4467_s5 + $0x188] sm:$0xff] }
 0x27a   : > { %v2101_v47 = vld [vmem:[%s4467_s5 + $0x40] sm:$0xff] }
 0x27b   : > { %2661 = vmatmul.mubr.msk.f32.vlgmr.msra.gmra.mrb[0].mxu1 %vm1780_vm8, %v1778_v13  ;;  %v2759_v13 = vpack.c.bf16 %v2104_v11, %v2102_v15  ;;  %v2761_v27 = vpack.c.bf16 %v2103_v14, %v2101_v47  ;;  %v2144_v15 = vld [vmem:[%s4467_s5 + $0x198] sm:$0xff]  ;;  %v2143_v47 = vld [vmem:[%s4467_s5 + $0x190] sm:$0xff]  ;;  %v2146_v14 = vld [vmem:[%s4467_s5 + $0x1a8] sm:$0xff] }
 0x27c   : > { %2754 = vmatpush1.bf16.msra.mxu1 %v2753_v7  ;;  %v2795_v7 = vpack.c.bf16 %v2140_v9, %v2138_v8  ;;  %v1907_v8 = vld [vmem:[%s4465_s3 + $0x170] sm:$0xff]  ;;  %v1912_v9 = vld [vmem:[%s4465_s3 + $0x198] sm:$0xff] }
 0x27d   : > { %2756 = vmatprep.subr.bf16.mxu1 %v2755_v10  ;;  %v2137_v10 = vld [vmem:[%s4467_s5 + $0x160] sm:$0xff] }
 0x27e   : > { %v2797_v11 = vpack.c.bf16 %v2139_v53, %v2137_v10  ;;  %v1911_v53 = vld [vmem:[%s4465_s3 + $0x190] sm:$0xff] }
 0x280   : > { %2758 = vmatpush1.bf16.msra.mxu1 %v2757_v12  ;;  %v2799_v12 = vpack.c.bf16 %v2144_v15, %v2142_v61  ;;  %v1915_v61 = vld [vmem:[%s4465_s3 + $0x1b0] sm:$0xff]  ;;  %v1920_v15 = vld [vmem:[%s4465_s3 + $0x1d8] sm:$0xff] }
 0x281   : > { %2760 = vmatprep.subr.bf16.mxu1 %v2759_v13  ;;  %v2141_v13 = vld [vmem:[%s4467_s5 + $0x180] sm:$0xff] }
 0x282   : > { %v2801_v22 = vpack.c.bf16 %v2143_v47, %v2141_v13  ;;  %v1919_v47 = vld [vmem:[%s4465_s3 + $0x1d0] sm:$0xff] }
 0x284   : > { %2762 = vmatpush1.bf16.msra.mxu1 %v2761_v27  ;;  %v2803_v27 = vpack.c.bf16 %v2148_v21, %v2146_v14  ;;  %v1923_v14 = vld [vmem:[%s4465_s3 + $0x1f0] sm:$0xff] }
 0x285   : > { %2764 = vmatprep.subr.bf16.mxu1 %v2763_v24  ;;  %v2145_v24 = vld [vmem:[%s4467_s5 + $0x1a0] sm:$0xff]  ;;  %v2749_v21 = vpack.c.bf16 %v1923_v14, %v1919_v47  ;;  %v2164_v47 = vld [vmem:[%s4467_s5 + $0x238] sm:$0xff] }
 0x286   : > { %v2805_v31 = vpack.c.bf16 %v2147_v25, %v2145_v24  ;;  %v2153_v25 = vld [vmem:[%s4467_s5 + $0x1e0] sm:$0xff] }
 0x288   : > { %2766 = vmatpush1.bf16.msra.mxu1 %v2765_v32  ;;  %v2807_v32 = vpack.c.bf16 %v2152_v17, %v2150_v6  ;;  %v2155_v6 = vld [vmem:[%s4467_s5 + $0x1f0] sm:$0xff] }
 0x289   : > { %2768 = vmatprep.subr.bf16.mxu1 %v2767_v58  ;;  %v2149_v58 = vld [vmem:[%s4467_s5 + $0x1c0] sm:$0xff]  ;;  %v2813_v17 = vpack.c.bf16 %v2155_v6, %v2153_v25  ;;  %v2163_v25 = vld [vmem:[%s4467_s5 + $0x230] sm:$0xff]  ;;  %v2166_v6 = vld [vmem:[%s4467_s5 + $0x248] sm:$0xff] }
 0x28a   : > { %v2809_v36 = vpack.c.bf16 %v2151_v33, %v2149_v58  ;;  %v2393_v33 = vld [vmem:[%s4469_s7 + $0x80] sm:$0xff] }
 0x28c   : > { %2770 = vmatpush1.bf16.msra.mxu1 %v2769_v46 }
 0x28d   : > { %2772 = vmatprep.subr.bf16.mxu1 %v2771_v23 }
 0x290   : > { %2774 = vmatpush1.bf16.msra.mxu1 %v2773_v42  ;;  %v1876_v42 = vld [vmem:[%s4465_s3 + $0x78] sm:$0xff] }
 0x291   : > { %2776 = vmatprep.subr.bf16.mxu1 %v2775_v44  ;;  %v2723_v20 = vpack.c.bf16 %v1876_v42, %v1872_v54  ;;  %v2379_v54 = vld [vmem:[%s4469_s7 + $0x10] sm:$0xff]  ;;  %v2380_v42 = vld [vmem:[%s4469_s7 + $0x18] sm:$0xff] }
 0x294   : > { %2778 = vmatpush1.bf16.msra.mxu1 %v2777_v45  ;;  %v1875_v45 = vld [vmem:[%s4465_s3 + $0x70] sm:$0xff] }
 0x295   : > { %2780 = vmatprep.subr.bf16.mxu1 %v2779_v43  ;;  %v1880_v43 = vld [vmem:[%s4465_s3 + $0x98] sm:$0xff] }
 0x296   : > { %v2727_v50 = vpack.c.bf16 %v1884_v49, %v1880_v43  ;;  %v2399_v43 = vld [vmem:[%s4469_s7 + $0xb0] sm:$0xff]  ;;  %v2400_v49 = vld [vmem:[%s4469_s7 + $0xb8] sm:$0xff] }
 0x298   : > { %2782 = vmatpush1.bf16.msra.mxu1 %v2781_v55  ;;  %v1888_v55 = vld [vmem:[%s4465_s3 + $0xd8] sm:$0xff] }
 0x299   : > { %2784 = vmatprep.subr.bf16.mxu1 %v2783_v60  ;;  %v1892_v60 = vld [vmem:[%s4465_s3 + $0xf8] sm:$0xff] }
 0x29a   : > { %v2731_v48 = vpack.c.bf16 %v1892_v60, %v1888_v55  ;;  %v2401_v55 = vld [vmem:[%s4469_s7 + $0xc0] sm:$0xff]  ;;  %v2402_v60 = vld [vmem:[%s4469_s7 + $0xc8] sm:$0xff] }
 0x29c   : > { %2786 = vmatpush1.bf16.msra.mxu1 %v2785_v57  ;;  %v1900_v57 = vld [vmem:[%s4465_s3 + $0x138] sm:$0xff] }
 0x29d   : > { %2788 = vmatprep.subr.bf16.mxu1 %v2787_v62  ;;  %v2733_v62 = vpack.c.bf16 %v1891_v1, %v1887_v19  ;;  %v2735_v0 = vpack.c.bf16 %v1900_v57, %v1896_v56  ;;  %v2385_v19 = vld [vmem:[%s4469_s7 + $0x40] sm:$0xff]  ;;  %v2386_v1 = vld [vmem:[%s4469_s7 + $0x48] sm:$0xff]  ;;  %v2403_v56 = vld [vmem:[%s4469_s7 + $0xd0] sm:$0xff] }
 0x29e   : > { %v2404_v57 = vld [vmem:[%s4469_s7 + $0xd8] sm:$0xff] }
 0x2a0   : > { %2790 = vmatpush1.bf16.msra.mxu1 %v2789_v3  ;;  %v1908_v3 = vld [vmem:[%s4465_s3 + $0x178] sm:$0xff] }
 0x2a1   : > { %2792 = vmatprep.subr.bf16.mxu1 %v2791_v4  ;;  %v2737_v4 = vpack.c.bf16 %v1899_v34, %v1895_v63  ;;  %v2739_v5 = vpack.c.bf16 %v1908_v3, %v1904_v59  ;;  %v2387_v63 = vld [vmem:[%s4469_s7 + $0x50] sm:$0xff]  ;;  %v2388_v34 = vld [vmem:[%s4469_s7 + $0x58] sm:$0xff]  ;;  %v2405_v59 = vld [vmem:[%s4469_s7 + $0xe0] sm:$0xff] }
 0x2a2   : > { %v2406_v3 = vld [vmem:[%s4469_s7 + $0xe8] sm:$0xff] }
 0x2a4   : > { %2794 = vmatpush1.bf16.msra.mxu1 %v2793_v52  ;;  %v1916_v52 = vld [vmem:[%s4465_s3 + $0x1b8] sm:$0xff] }
 0x2a5   : > { %2796 = vmatprep.subr.bf16.mxu1 %v2795_v7  ;;  %v2741_v7 = vpack.c.bf16 %v1907_v8, %v1903_v16  ;;  %v2743_v10 = vpack.c.bf16 %v1916_v52, %v1912_v9  ;;  %v1929_v16 = vsub.s32 0, %v3195_v18  ;;  %v4218_v8 = vld [vmem:[%s4466_s4] sm:$0xf]  ;;  %v1933_v9 = vsub.s32 1, %v3195_v18 }
 0x2a7   : > { %v1930_v52 = vrot.slane %v4218_v8, %v1929_v16 }
 0x2a8   : > { %2798 = vmatpush1.bf16.msra.mxu1 %v2797_v11  ;;  %v1924_v11 = vld [vmem:[%s4465_s3 + $0x1f8] sm:$0xff] }
 0x2a9   : > { %2800 = vmatprep.subr.bf16.mxu1 %v2799_v12  ;;  %v2745_v12 = vpack.c.bf16 %v1915_v61, %v1911_v53  ;;  %v2747_v13 = vpack.c.bf16 %v1924_v11, %v1920_v15  ;;  %v2157_v15 = vld [vmem:[%s4467_s5 + $0x200] sm:$0xff]  ;;  %v2159_v11 = vld [vmem:[%s4467_s5 + $0x210] sm:$0xff] }
 0x2ac   : > { %2802 = vmatpush1.bf16.msra.mxu1 %v2801_v22  ;;  %v2154_v22 = vld [vmem:[%s4467_s5 + $0x1e8] sm:$0xff] }
 0x2ad   : > { %2804 = vmatprep.subr.bf16.mxu1 %v2803_v27  ;;  %v2156_v27 = vld [vmem:[%s4467_s5 + $0x1f8] sm:$0xff] }
 0x2ae   : > { %v2811_v24 = vpack.c.bf16 %v2156_v27, %v2154_v22 }
 0x2b0   : > { %2806 = vmatpush1.bf16.msra.mxu1 %v2805_v31  ;;  %v2158_v31 = vld [vmem:[%s4467_s5 + $0x208] sm:$0xff] }
 0x2b1   : > { %2808 = vmatprep.subr.bf16.mxu1 %v2807_v32  ;;  %v2160_v32 = vld [vmem:[%s4467_s5 + $0x218] sm:$0xff] }
 0x2b2   : > { %v2815_v58 = vpack.c.bf16 %v2160_v32, %v2158_v31 }
 0x2b4   : > { %2810 = vmatpush1.bf16.msra.mxu1 %v2809_v36  ;;  %v2394_v36 = vld [vmem:[%s4469_s7 + $0x88] sm:$0xff] }
 0x2b5   : > { %2812 = vmatprep.subr.bf16.mxu1 %v2811_v24  ;;  %v2161_v24 = vld [vmem:[%s4467_s5 + $0x220] sm:$0xff] }
 0x2b6   : > { %v2821_v31 = vpack.c.bf16 %v2163_v25, %v2161_v24  ;;  %v2197_v24 = vld [vmem:[%s4467_s5 + $0x340] sm:$0xff]  ;;  %v2199_v25 = vld [vmem:[%s4467_s5 + $0x350] sm:$0xff] }
 0x2b8   : > { %2814 = vmatpush1.bf16.msra.mxu1 %v2813_v17  ;;  %v2168_v17 = vld [vmem:[%s4467_s5 + $0x258] sm:$0xff] }
 0x2b9   : > { %2816 = vmatprep.subr.bf16.mxu1 %v2815_v58  ;;  %v2823_v32 = vpack.c.bf16 %v2168_v17, %v2166_v6  ;;  %v2165_v58 = vld [vmem:[%s4467_s5 + $0x240] sm:$0xff]  ;;  %v2202_v6 = vld [vmem:[%s4467_s5 + $0x368] sm:$0xff]  ;;  %v2204_v17 = vld [vmem:[%s4467_s5 + $0x378] sm:$0xff] }
 0x34e   : > { %v1850_v37 = vpop.f32.mrb[0].mxu1 }
 0x34f   : > { %v2564_v29 = vmul.f32 -1.442695, %v1850_v37  ;;  %v2662_v46 = vpop.f32.mrb[1].mxu1  ;;  %v2377_v37 = vld [vmem:[%s4469_s7] sm:$0xff] }
 0x350   : > { %v2378_v46 = vld [vmem:[%s4469_s7 + $0x8] sm:$0xff] }
 0x351   : > { %2942 = vpow2.f32 %v2564_v29  ;;  %v2879_v29 = vpack.c.bf16 %v2394_v36, %v2393_v33  ;;  %v2881_v40 = vpack.c.bf16 %v2378_v46, %v2377_v37  ;;  %v2167_v33 = vld [vmem:[%s4467_s5 + $0x250] sm:$0xff]  ;;  %v2170_v36 = vld [vmem:[%s4467_s5 + $0x268] sm:$0xff]  ;;  %v2172_v37 = vld [vmem:[%s4467_s5 + $0x278] sm:$0xff] }
 0x352   : > { %v2827_v46 = vpack.c.bf16 %v2172_v37, %v2170_v36  ;;  %v2206_v36 = vld [vmem:[%s4467_s5 + $0x388] sm:$0xff]  ;;  %v2208_v37 = vld [vmem:[%s4467_s5 + $0x398] sm:$0xff] }
 0x35b   : > { %v2943_v23 = vpop.eup %2942 }
 0x35c   : > { %v1857_v30 = vadd.f32 1.0, %v2943_v23  ;;  %v2395_v23 = vld [vmem:[%s4469_s7 + $0x90] sm:$0xff] }
 0x35e   : > { %2944 = vrcp.f32 %v1857_v30  ;;  %v2396_v30 = vld [vmem:[%s4469_s7 + $0x98] sm:$0xff] }
 0x35f   : > { %v2883_v41 = vpack.c.bf16 %v2396_v30, %v2395_v23  ;;  %v2169_v23 = vld [vmem:[%s4467_s5 + $0x260] sm:$0xff]  ;;  %v2171_v30 = vld [vmem:[%s4467_s5 + $0x270] sm:$0xff] }
 0x368   : > { %v2945_v44 = vpop.eup %2944 }
 0x369   : > { %v1860_v2 = vmul.f32 %v2945_v44, %v3737_v35  ;;  %v2725_v35 = vpack.c.bf16 %v1875_v45, %v1871_v39  ;;  %v2397_v44 = vld [vmem:[%s4469_s7 + $0xa0] sm:$0xff]  ;;  %v2382_v45 = vld [vmem:[%s4469_s7 + $0x28] sm:$0xff] }
 0x36a   : > { %v2381_v39 = vld [vmem:[%s4469_s7 + $0x20] sm:$0xff] }
 0x36b   : > { %2012 = vmatmul.mubr.f32.vlgmr.msra.gmra.mrb[2].mxu0 %v1860_v2 }
 0x36c   : > { %2722 = vmatpush1.bf16.msra.mxu0 %v2721_v38  ;;  %2082 = vmatprep.mubr.f32.mxu0 %v2972_v28  ;;  %v2729_v28 = vpack.c.bf16 %v1883_v26, %v1879_v51  ;;  %v2398_v38 = vld [vmem:[%s4469_s7 + $0xa8] sm:$0xff]  ;;  %v2383_v51 = vld [vmem:[%s4469_s7 + $0x30] sm:$0xff]  ;;  %v2384_v26 = vld [vmem:[%s4469_s7 + $0x38] sm:$0xff] }
 0x36d   : > { %2724 = vmatprep.subr.bf16.mxu0 %v2723_v20  ;;  %v2887_v20 = vpack.c.bf16 %v2398_v38, %v2397_v44  ;;  %v2173_v44 = vld [vmem:[%s4467_s5 + $0x280] sm:$0xff]  ;;  %v2175_v38 = vld [vmem:[%s4467_s5 + $0x290] sm:$0xff] }
 0x370   : > { %2726 = vmatpush1.bf16.msra.mxu0 %v2725_v35  ;;  %v2889_v35 = vpack.c.bf16 %v2382_v45, %v2381_v39  ;;  %v2833_v39 = vpack.c.bf16 %v2175_v38, %v2173_v44  ;;  %v2209_v44 = vld [vmem:[%s4467_s5 + $0x3a0] sm:$0xff]  ;;  %v2211_v38 = vld [vmem:[%s4467_s5 + $0x3b0] sm:$0xff] }
 0x371   : > { %2728 = vmatprep.subr.bf16.mxu0 %v2727_v50  ;;  %v2891_v50 = vpack.c.bf16 %v2400_v49, %v2399_v43  ;;  %v2177_v43 = vld [vmem:[%s4467_s5 + $0x2a0] sm:$0xff]  ;;  %v2179_v49 = vld [vmem:[%s4467_s5 + $0x2b0] sm:$0xff] }
 0x374   : > { %2730 = vmatpush1.bf16.msra.mxu0 %v2729_v28  ;;  %v2893_v28 = vpack.c.bf16 %v2384_v26, %v2383_v51  ;;  %v2837_v51 = vpack.c.bf16 %v2179_v49, %v2177_v43  ;;  %v2213_v49 = vld [vmem:[%s4467_s5 + $0x3c0] sm:$0xff] }
 0x375   : > { %2732 = vmatprep.subr.bf16.mxu0 %v2731_v48  ;;  %v2895_v48 = vpack.c.bf16 %v2402_v60, %v2401_v55  ;;  %v2181_v55 = vld [vmem:[%s4467_s5 + $0x2c0] sm:$0xff]  ;;  %v2183_v60 = vld [vmem:[%s4467_s5 + $0x2d0] sm:$0xff] }
 0x378   : > { %2734 = vmatpush1.bf16.msra.mxu0 %v2733_v62  ;;  %v2897_v62 = vpack.c.bf16 %v2386_v1, %v2385_v19  ;;  %v2188_v19 = vld [vmem:[%s4467_s5 + $0x2f8] sm:$0xff]  ;;  %v2841_v1 = vpack.c.bf16 %v2183_v60, %v2181_v55 }
 0x379   : > { %2736 = vmatprep.subr.bf16.mxu0 %v2735_v0  ;;  %v2899_v0 = vpack.c.bf16 %v2404_v57, %v2403_v56  ;;  %v2185_v57 = vld [vmem:[%s4467_s5 + $0x2e0] sm:$0xff] }
 0x37c   : > { %2738 = vmatpush1.bf16.msra.mxu0 %v2737_v4  ;;  %v2901_v4 = vpack.c.bf16 %v2388_v34, %v2387_v63  ;;  %v2190_v63 = vld [vmem:[%s4467_s5 + $0x308] sm:$0xff]  ;;  %v2192_v34 = vld [vmem:[%s4467_s5 + $0x318] sm:$0xff] }
 0x37d   : > { %2740 = vmatprep.subr.bf16.mxu0 %v2739_v5  ;;  %v2903_v5 = vpack.c.bf16 %v2406_v3, %v2405_v59 }
 0x380   : > { %2742 = vmatpush1.bf16.msra.mxu0 %v2741_v7  ;;  %v1934_v7 = vrot.slane %v4218_v8, %v1933_v9 }
 0x381   : > { %2744 = vmatprep.subr.bf16.mxu0 %v2743_v10 }
 0x384   : > { %2746 = vmatpush1.bf16.msra.mxu0 %v2745_v12 }
 0x385   : > { %2748 = vmatprep.subr.bf16.mxu0 %v2747_v13  ;;  %v2162_v13 = vld [vmem:[%s4467_s5 + $0x228] sm:$0xff] }
 0x386   : > { %v2819_v27 = vpack.c.bf16 %v2164_v47, %v2162_v13  ;;  %v2193_v13 = vld [vmem:[%s4467_s5 + $0x320] sm:$0xff]  ;;  %v2195_v47 = vld [vmem:[%s4467_s5 + $0x330] sm:$0xff] }
 0x388   : > { %2750 = vmatpush1.bf16.msra.mxu0 %v2749_v21  ;;  %v2817_v21 = vpack.c.bf16 %v2159_v11, %v2157_v15 }
 0x389   : > { %2880 = vmatprep.subr.bf16.mxu0 %v2879_v29  ;;  %v2825_v29 = vpack.c.bf16 %v2167_v33, %v2165_v58  ;;  %v2201_v58 = vld [vmem:[%s4467_s5 + $0x360] sm:$0xff]  ;;  %v2203_v33 = vld [vmem:[%s4467_s5 + $0x370] sm:$0xff] }
 0x38b   : > { %2083 = vmatmul.mubr.f32.vlgmr.msra.gmra.mrb[4].mxu0 %v1860_v2  ;;  %v2885_v2 = vpack.c.bf16 %v2380_v42, %v2379_v54  ;;  %v2829_v54 = vpack.c.bf16 %v2171_v30, %v2169_v23  ;;  %v2205_v23 = vld [vmem:[%s4467_s5 + $0x380] sm:$0xff]  ;;  %v2207_v30 = vld [vmem:[%s4467_s5 + $0x390] sm:$0xff] }
 0x38c   : > { %2882 = vmatpush3.bf16.msra.mxu0 %v2881_v40  ;;  %v2174_v40 = vld [vmem:[%s4467_s5 + $0x288] sm:$0xff] }
 0x38d   : > { %2884 = vmatprep.subr.bf16.mxu0 %v2883_v41  ;;  %v2176_v41 = vld [vmem:[%s4467_s5 + $0x298] sm:$0xff] }
 0x38e   : > { %v2831_v42 = vpack.c.bf16 %v2176_v41, %v2174_v40  ;;  %v2210_v40 = vld [vmem:[%s4467_s5 + $0x3a8] sm:$0xff]  ;;  %v2212_v41 = vld [vmem:[%s4467_s5 + $0x3b8] sm:$0xff] }
 0x390   : > { %2886 = vmatpush3.bf16.msra.mxu0 %v2885_v2  ;;  %v2178_v2 = vld [vmem:[%s4467_s5 + $0x2a8] sm:$0xff] }
 0x391   : > { %2888 = vmatprep.subr.bf16.mxu0 %v2887_v20  ;;  %v2180_v20 = vld [vmem:[%s4467_s5 + $0x2b8] sm:$0xff] }
 0x392   : > { %v2835_v45 = vpack.c.bf16 %v2180_v20, %v2178_v2  ;;  %v2214_v2 = vld [vmem:[%s4467_s5 + $0x3c8] sm:$0xff]  ;;  %v2216_v20 = vld [vmem:[%s4467_s5 + $0x3d8] sm:$0xff] }
 0x393   : > { %v2871_v43 = vpack.c.bf16 %v2216_v20, %v2214_v2 }
 0x394   : > { %2890 = vmatpush3.bf16.msra.mxu0 %v2889_v35  ;;  %v2182_v35 = vld [vmem:[%s4467_s5 + $0x2c8] sm:$0xff] }
 0x395   : > { %2892 = vmatprep.subr.bf16.mxu0 %v2891_v50  ;;  %v2184_v50 = vld [vmem:[%s4467_s5 + $0x2d8] sm:$0xff] }
 0x396   : > { %v2839_v26 = vpack.c.bf16 %v2184_v50, %v2182_v35  ;;  %v2215_v35 = vld [vmem:[%s4467_s5 + $0x3d0] sm:$0xff]  ;;  %v2218_v50 = vld [vmem:[%s4467_s5 + $0x3e8] sm:$0xff] }
 0x398   : > { %2894 = vmatpush3.bf16.msra.mxu0 %v2893_v28  ;;  %v1941_v28 = vsub.s32 3, %v3195_v18 }
 0x399   : > { %2896 = vmatprep.subr.bf16.mxu0 %v2895_v48  ;;  %v2186_v48 = vld [vmem:[%s4467_s5 + $0x2e8] sm:$0xff] }
 0x39a   : > { %v2843_v56 = vpack.c.bf16 %v2188_v19, %v2186_v48  ;;  %v2219_v48 = vld [vmem:[%s4467_s5 + $0x3f0] sm:$0xff] }
 0x39c   : > { %2898 = vmatpush3.bf16.msra.mxu0 %v2897_v62  ;;  %v2187_v62 = vld [vmem:[%s4467_s5 + $0x2f0] sm:$0xff] }
 0x39d   : > { %2900 = vmatprep.subr.bf16.mxu0 %v2899_v0  ;;  %v1942_v0 = vrot.slane %v4218_v8, %v1941_v28  ;;  %v2845_v3 = vpack.c.bf16 %v2187_v62, %v2185_v57  ;;  %v2217_v28 = vld [vmem:[%s4467_s5 + $0x3e0] sm:$0xff]  ;;  %v2390_v57 = vld [vmem:[%s4469_s7 + $0x68] sm:$0xff] }
 0x39e   : > { %v2877_v19 = vpack.c.bf16 %v2219_v48, %v2217_v28 }
 0x3a0   : > { %2902 = vmatpush3.bf16.msra.mxu0 %v2901_v4 }
 0x3a1   : > { %2904 = vmatprep.subr.bf16.mxu0 %v2903_v5  ;;  %v2847_v5 = vpack.c.bf16 %v2192_v34, %v2190_v63  ;;  %v2408_v63 = vld [vmem:[%s4469_s7 + $0xf8] sm:$0xff] }
 0x43e   : > { %v2013_v10 = vpop.f32.mrb[2].mxu0 }
 0x43f   : > { %v2014_v53 = vadd.f32 %v2013_v10, %v1930_v52  ;;  %v2015_v61 = vpop.f32.mrb[3].mxu0  ;;  %v2189_v52 = vld [vmem:[%s4467_s5 + $0x300] sm:$0xff] }
 0x440   : > { %v2016_v12 = vadd.f32 %v2015_v61, %v1934_v7  ;;  %v2191_v7 = vld [vmem:[%s4467_s5 + $0x310] sm:$0xff]  ;;  %v2196_v61 = vld [vmem:[%s4467_s5 + $0x338] sm:$0xff] }
 0x441   : > { %v2089_v22 = vmax.f32 %v2014_v53, 0.0  ;;  %v2194_v53 = vld [vmem:[%s4467_s5 + $0x328] sm:$0xff]  ;;  %v2849_v11 = vpack.c.bf16 %v2191_v7, %v2189_v52 }
 0x442   : > { %v2090_v14 = vmax.f32 %v2016_v12, 0.0  ;;  %v2851_v12 = vpack.c.bf16 %v2196_v61, %v2194_v53 }
 0x444   : > { %2297 = vmatprep.mubr.f32.mxu1 %v2090_v14  ;;  %v2198_v14 = vld [vmem:[%s4467_s5 + $0x348] sm:$0xff] }
 0x445   : > { %2298 = vmatmul.mubr.f32.vlgmr.msra.gmra.mrb[2].mxu1 %v2089_v22  ;;  %v2853_v22 = vpack.c.bf16 %v2195_v47, %v2193_v13  ;;  %v2565_v47 = vld [vmem:[%s4470_s8] ss:$0 sm:$0xff] }
 0x446   : > { %2818 = vmatpush1.bf16.msra.mxu1 %v2817_v21  ;;  %v2200_v21 = vld [vmem:[%s4467_s5 + $0x358] sm:$0xff] }
 0x447   : > { %2820 = vmatprep.subr.bf16.mxu1 %v2819_v27  ;;  %v2855_v27 = vpack.c.bf16 %v2200_v21, %v2198_v14 }
 0x44a   : > { %2822 = vmatpush1.bf16.msra.mxu1 %v2821_v31  ;;  %v2857_v31 = vpack.c.bf16 %v2199_v25, %v2197_v24 }
 0x44b   : > { %2824 = vmatprep.subr.bf16.mxu1 %v2823_v32  ;;  %v2859_v32 = vpack.c.bf16 %v2204_v17, %v2202_v6 }
 0x44e   : > { %2826 = vmatpush1.bf16.msra.mxu1 %v2825_v29  ;;  %v2861_v29 = vpack.c.bf16 %v2203_v33, %v2201_v58 }
 0x44f   : > { %2828 = vmatprep.subr.bf16.mxu1 %v2827_v46  ;;  %v2863_v46 = vpack.c.bf16 %v2208_v37, %v2206_v36 }
 0x452   : > { %2830 = vmatpush1.bf16.msra.mxu1 %v2829_v54  ;;  %v2865_v54 = vpack.c.bf16 %v2207_v30, %v2205_v23 }
 0x453   : > { %2832 = vmatprep.subr.bf16.mxu1 %v2831_v42  ;;  %v2867_v42 = vpack.c.bf16 %v2212_v41, %v2210_v40 }
 0x456   : > { %2834 = vmatpush1.bf16.msra.mxu1 %v2833_v39  ;;  %v2869_v39 = vpack.c.bf16 %v2211_v38, %v2209_v44 }
 0x457   : > { %2836 = vmatprep.subr.bf16.mxu1 %v2835_v45  ;;  %v1937_v45 = vsub.s32 2, %v3195_v18 }
 0x459   : > { %v1938_v55 = vrot.slane %v4218_v8, %v1937_v45  ;;  %v2389_v8 = vld [vmem:[%s4469_s7 + $0x60] sm:$0xff] }
 0x45a   : > { %2838 = vmatpush1.bf16.msra.mxu1 %v2837_v51  ;;  %v2220_v51 = vld [vmem:[%s4467_s5 + $0x3f8] sm:$0xff]  ;;  %v2905_v62 = vpack.c.bf16 %v2390_v57, %v2389_v8 }
 0x45b   : > { %2840 = vmatprep.subr.bf16.mxu1 %v2839_v26  ;;  %v2873_v26 = vpack.c.bf16 %v2215_v35, %v2213_v49  ;;  %v2875_v60 = vpack.c.bf16 %v2220_v51, %v2218_v50 }
 0x45c   : > { %2906 = vmatpush3.bf16.msra.mxu0 %v2905_v62 }
 0x45e   : > { %v4325_v59 = vpop.f32.mrb[4].mxu0  ;;  %2842 = vmatpush1.bf16.msra.mxu1 %v2841_v1 }
 0x45f   : > { %v2086_v4 = vpop.f32.mrb[5].mxu0  ;;  %2844 = vmatprep.subr.bf16.mxu1 %v2843_v56  ;;  %v2085_v1 = vadd.f32 %v4325_v59, %v1938_v55  ;;  %v2391_v59 = vld [vmem:[%s4469_s7 + $0x70] sm:$0xff] }
 0x460   : > { %v2087_v10 = vadd.f32 %v2086_v4, %v1942_v0  ;;  %v2407_v0 = vld [vmem:[%s4469_s7 + $0xf0] sm:$0xff] }
 0x461   : > { %v2091_v56 = vmax.f32 %v2085_v1, 0.0  ;;  %v2907_v34 = vpack.c.bf16 %v2408_v63, %v2407_v0 }
 0x462   : > { %v2092_v15 = vmax.f32 %v2087_v10, 0.0  ;;  %2846 = vmatpush1.bf16.msra.mxu1 %v2845_v3  ;;  %v2392_v3 = vld [vmem:[%s4469_s7 + $0x78] sm:$0xff] }
 0x463   : > { %2848 = vmatprep.subr.bf16.mxu1 %v2847_v5  ;;  %v2909_v4 = vpack.c.bf16 %v2392_v3, %v2391_v59  ;;  %2908 = vmatprep.subr.bf16.mxu0 %v2907_v34  ;;  %v2221_v5 = vld [vmem:[%s4468_s6] sm:$0x3] }
 0x464   : > { %2368 = vmatprep.mubr.f32.mxu1 %v2092_v15  ;;  %v2226_v52 = vrot.slane %v2221_v5, %v1929_v16  ;;  %v2230_v7 = vrot.slane %v2221_v5, %v1933_v9 }
 0x465   : > { %2910 = vmatpush3.bf16.msra.mxu0 %v2909_v4 }
 0x466   : > { %2850 = vmatpush1.bf16.msra.mxu1 %v2849_v11 }
 0x467   : > { %2852 = vmatprep.subr.bf16.mxu1 %v2851_v12 }
 0x46a   : > { %2854 = vmatpush1.bf16.msra.mxu1 %v2853_v22 }
 0x46b   : > { %2856 = vmatprep.subr.bf16.mxu1 %v2855_v27 }
 0x46e   : > { %2858 = vmatpush1.bf16.msra.mxu1 %v2857_v31 }
 0x46f   : > { %2860 = vmatprep.subr.bf16.mxu1 %v2859_v32 }
 0x472   : > { %2862 = vmatpush1.bf16.msra.mxu1 %v2861_v29 }
 0x473   : > { %2864 = vmatprep.subr.bf16.mxu1 %v2863_v46 }
 0x476   : > { %2866 = vmatpush1.bf16.msra.mxu1 %v2865_v54 }
 0x477   : > { %2868 = vmatprep.subr.bf16.mxu1 %v2867_v42 }
 0x47a   : > { %2870 = vmatpush1.bf16.msra.mxu1 %v2869_v39 }
 0x47b   : > { %2872 = vmatprep.subr.bf16.mxu1 %v2871_v43 }
 0x47e   : > { %2874 = vmatpush1.bf16.msra.mxu1 %v2873_v26 }
 0x47f   : > { %2876 = vmatprep.subr.bf16.mxu1 %v2875_v60 }
 0x482   : > { %2878 = vmatpush1.bf16.msra.mxu1 %v2877_v19 }
 0x485   : > { %2369 = vmatmul.mubr.f32.vlgmr.msra.gmra.mrb[2].mxu1 %v2091_v56 }
 0x558   : > { %v2370_v10 = vpop.f32.mrb[2].mxu1 }
 0x559   : > { %v2911_v53 = vadd.f32 %v2370_v10, %v2226_v52  ;;  %v2372_v61 = vpop.f32.mrb[3].mxu1 }
 0x55a   : > { %v2912_v15 = vadd.f32 %v2372_v61, %v2230_v7 }
 0x55b   : > { %v2375_v12 = vmax.f32 %v2911_v53, 0.0 }
 0x55c   : > { %v2376_v11 = vmax.f32 %v2912_v15, 0.0 }
 0x55e   : > { %2480 = vmatprep.mubr.f32.mxu0 %v2376_v11 }
 0x55f   : > { %2481 = vmatmul.mubr.f32.vlgmr.msra.gmra.mrb[6].mxu0 %v2375_v12 }
 0x632   : > { %v2620_v13 = vpop.f32.mrb[6].mxu0 }
 0x633   : > { %v2621_v16 = vpop.f32.mrb[7].mxu0 }
 0x634   : > { %v2622_v14 = vadd.f32 %v2621_v16, %v2620_v13 }
 0x636   : > { %v2483_v18 = vadd.f32 %v2622_v14, %v2565_v47 }
 0x638   : > { %2486 = vst [vmem:[%s358_s16] sm:$0xff] %v2483_v18 }
 0x639 PF: > { %s19_s11 = sadd.s32 1, %s2968_s11   ;;  %s4472_s30 = smov %s2964_s10 }
 0x63a   : > { %p16_p6 = scmp.ge.s32.totalorder %s19_s11, 4   ;;  %s4473_s10 = smov %s4475_s12 }
 0x63c   :  { %18 = sbr.rel (!%p16_p6) target bundleno = 2 (0x2), region = 94 }

</bundles_post_ra>
